<compile_context>
chip_gen: v6e
topology: v6e:2x2x1
jax: 0.10.0
libtpu: 0.0.40
codegen_flags: <defaults>
</compile_context>

<pallas_src>
import functools

import jax
import jax.numpy as jnp
from jax.experimental import pallas as pl
from jax.experimental.pallas import tpu as pltpu
import numpy as np

BN_EPS = 1e-5
LEAKY_SLOPE = 0.2
LANE = 128
SUBLANE_BF16 = 16

# Row layout of the packed vector buffer (one small (1, d) vector per row).
(ROW_B1, ROW_B2, ROW_G2, ROW_BE2,
 ROW_B3, ROW_G3, ROW_BE3,
 ROW_B4, ROW_G4, ROW_BE4, ROW_B5) = range(11)
_NUM_VEC_ROWS = 11


def _round_up(n, m):
    return (n + m - 1) // m * m


def _leaky_relu(x):
    return jnp.where(x > 0, x, LEAKY_SLOPE * x)


def _batchnorm_train(x, gamma, beta):
    # BatchNorm1d forward, training mode: batch mean, biased batch variance.
    mean = jnp.mean(x, axis=0, keepdims=True)
    var = jnp.mean((x - mean) ** 2, axis=0, keepdims=True)
    return gamma * (x - mean) * jax.lax.rsqrt(var + BN_EPS) + beta


def _make_decoder_kernel(n_valid, b_pad, widths):
    """Build the kernel body.

    n_valid: true (unpadded) batch size — static Python int.
    b_pad:   padded batch size (multiple of 16) — static Python int.
    widths:  (h1_p, d2_p, d3_p, d4_p, out_p) padded feature widths.
    """
    h1_p, d2_p, d3_p, d4_p, out_p = widths
    need_mask = (n_valid != b_pad)
    inv_n = 1.0 / float(n_valid)

    def bn(x, gamma, beta, mask):
        # Exact training-mode BatchNorm1d over the VALID rows only; padded
        # rows are masked out of the statistics.  rsqrt rides the EUP slot.
        if need_mask:
            mean = jnp.sum(x * mask, axis=0, keepdims=True) * inv_n
            diff = x - mean
            var = jnp.sum((diff * diff) * mask, axis=0, keepdims=True) * inv_n
        else:
            mean = jnp.mean(x, axis=0, keepdims=True)
            diff = x - mean
            var = jnp.mean(diff * diff, axis=0, keepdims=True)
        return gamma * diff * jax.lax.rsqrt(var + BN_EPS) + beta

    def kernel(x_ref, w1_ref, w2_ref, w3_ref, w4_ref, w5_ref, vec_ref, o_ref):
        def v(row, width):
            # Static, lane-aligned slice of one packed vector row -> (1, width).
            return vec_ref[row:row + 1, :width]

        if need_mask:
            row_ids = jax.lax.broadcasted_iota(jnp.int32, (b_pad, 1), 0)
            mask = (row_ids < n_valid).astype(jnp.float32)
        else:
            mask = None

        x = x_ref[...]                                   # (b_pad, d_in_p) bf16

        # Linear(nz + n_cond, nz*2) + ReLU
        h = jnp.dot(x, w1_ref[...],
                    preferred_element_type=jnp.float32) + v(ROW_B1, h1_p)
        h = jnp.maximum(h, 0.0)

        # Linear(nz*2, nz*4) + LeakyReLU(0.2) + BatchNorm1d(nz*4)
        h = jnp.dot(h.astype(jnp.bfloat16), w2_ref[...],
                    preferred_element_type=jnp.float32) + v(ROW_B2, d2_p)
        h = _leaky_relu(h)
        h = bn(h, v(ROW_G2, d2_p), v(ROW_BE2, d2_p), mask)

        # Linear(nz*4, nz*8) + LeakyReLU(0.2) + BatchNorm1d(nz*8)
        h = jnp.dot(h.astype(jnp.bfloat16), w3_ref[...],
                    preferred_element_type=jnp.float32) + v(ROW_B3, d3_p)
        h = _leaky_relu(h)
        h = bn(h, v(ROW_G3, d3_p), v(ROW_BE3, d3_p), mask)

        # Linear(nz*8, nz*16) + LeakyReLU(0.2) + BatchNorm1d(nz*16)
        h = jnp.dot(h.astype(jnp.bfloat16), w4_ref[...],
                    preferred_element_type=jnp.float32) + v(ROW_B4, d4_p)
        h = _leaky_relu(h)
        h = bn(h, v(ROW_G4, d4_p), v(ROW_BE4, d4_p), mask)

        # Linear(nz*16, ndf - n_cond)
        h = jnp.dot(h.astype(jnp.bfloat16), w5_ref[...],
                    preferred_element_type=jnp.float32) + v(ROW_B5, out_p)
        o_ref[...] = h.astype(o_ref.dtype)

    return kernel


def make_decoder_params(nz, n_cond, ndf, key):
    """Deterministic synthetic parameters matching the PyTorch module shapes."""
    dims = [nz + n_cond, nz * 2, nz * 4, nz * 8, nz * 16, ndf - n_cond]
    keys = jax.random.split(key, 10)
    params = {}
    for li in range(5):
        fan_in, fan_out = dims[li], dims[li + 1]
        wk, bk = keys[2 * li], keys[2 * li + 1]
        params[f"w{li + 1}"] = (
            jax.random.normal(wk, (fan_in, fan_out), jnp.float32) * 0.05
        )
        params[f"b{li + 1}"] = (
            jax.random.normal(bk, (1, fan_out), jnp.float32) * 0.01
        )
    # BatchNorm affine params (gamma=1, beta=0 at init, like nn.BatchNorm1d)
    for li, d in zip((2, 3, 4), (nz * 4, nz * 8, nz * 16)):
        params[f"g{li}"] = jnp.ones((1, d), jnp.float32)
        params[f"be{li}"] = jnp.zeros((1, d), jnp.float32)
    return params


def prepare_decoder_params(params):
    """One-time preparation: zero-pad to lane-dense shapes, cast weights to
    bf16, and pack the 11 small vectors into a single lane-dense 2-D buffer.

    Call this ONCE and reuse the result on every forward call (the per-call
    path no longer rebuilds / re-casts any weights)."""
    f32, bf16 = jnp.float32, jnp.bfloat16
    d_in, h1 = params["w1"].shape
    d2 = params["w2"].shape[1]
    d3 = params["w3"].shape[1]
    d4 = params["w4"].shape[1]
    out_dim = params["w5"].shape[1]

    d_in_p = _round_up(d_in, LANE)
    h1_p = _round_up(h1, LANE)
    d2_p = _round_up(d2, LANE)
    d3_p = _round_up(d3, LANE)
    d4_p = _round_up(d4, LANE)
    out_p = _round_up(out_dim, LANE)

    def pad_w(w, rp, cp):
        r, c = w.shape
        return jnp.zeros((rp, cp), f32).at[:r, :c].set(w).astype(bf16)

    prepped = {
        "w1": pad_w(params["w1"], d_in_p, h1_p),
        "w2": pad_w(params["w2"], h1_p, d2_p),
        "w3": pad_w(params["w3"], d2_p, d3_p),
        "w4": pad_w(params["w4"], d3_p, d4_p),
        "w5": pad_w(params["w5"], d4_p, out_p),
    }

    # Packed vector buffer: one row per vector, zero-padded to the widest
    # padded feature dim.  (11, max_w) f32 is far smaller sublane-padded than
    # a (1, N) strip and still a single DMA.
    vec_w = max(h1_p, d2_p, d3_p, d4_p, out_p)
    row_order = [
        ("b1",), ("b2",), ("g2",), ("be2",),
        ("b3",), ("g3",), ("be3",),
        ("b4",), ("g4",), ("be4",), ("b5",),
    ]
    vec = jnp.zeros((_NUM_VEC_ROWS, vec_w), f32)
    for i, (name,) in enumerate(row_order):
        v = params[name].reshape(-1)
        vec = vec.at[i, : v.shape[0]].set(v)
    prepped["vec"] = vec
    return prepped, out_dim


@functools.partial(jax.jit, static_argnums=(3,))
def _decoder_forward_impl(x, conditions, prepped, out_dim):
    f32, bf16 = jnp.float32, jnp.bfloat16

    # Layout glue: concat latent + conditions along the feature axis.
    x_cat = jnp.concatenate([x, conditions], axis=-1).astype(f32)
    B, d_in = x_cat.shape

    w1, w2, w3, w4, w5 = (prepped[k] for k in ("w1", "w2", "w3", "w4", "w5"))
    vec = prepped["vec"]
    d_in_p, h1_p = w1.shape
    d2_p = w2.shape[1]
    d3_p = w3.shape[1]
    d4_p = w4.shape[1]
    out_p = w5.shape[1]

    # Pad batch to a full bf16 sublane tile (16) so MXU feeds are dense;
    # padded rows are masked out of the BatchNorm statistics in-kernel.
    b_pad = _round_up(max(B, SUBLANE_BF16), SUBLANE_BF16)

    # Zero-pad input features to 128 lanes and cast to bf16 (MXU feed).
    x_pad = jnp.zeros((b_pad, d_in_p), f32).at[:B, :d_in].set(x_cat).astype(bf16)

    widths = (h1_p, d2_p, d3_p, d4_p, out_p)
    kernel = _make_decoder_kernel(n_valid=B, b_pad=b_pad, widths=widths)

    flops = 2 * b_pad * (d_in_p * h1_p + h1_p * d2_p + d2_p * d3_p
                         + d3_p * d4_p + d4_p * out_p)
    transcendentals = d2_p + d3_p + d4_p          # rsqrt per BN feature
    bytes_accessed = (
        x_pad.size * 2
        + 2 * (w1.size + w2.size + w3.size + w4.size + w5.size)
        + vec.size * 4
        + b_pad * out_p * 4
    )

    vmem_spec = pl.BlockSpec(memory_space=pltpu.MemorySpace.VMEM)
    out_padded = pl.pallas_call(
        kernel,
        out_shape=jax.ShapeDtypeStruct((b_pad, out_p), jnp.float32),
        in_specs=[vmem_spec] * 7,
        out_specs=vmem_spec,
        cost_estimate=pl.CostEstimate(
            flops=flops,
            transcendentals=transcendentals,
            bytes_accessed=bytes_accessed,
        ),
    )(x_pad, w1, w2, w3, w4, w5, vec)

    return out_padded[:B, :out_dim]


def decoder_forward(x, conditions, prepped, out_dim):
    """Jitted forward.  `prepped, out_dim` come from prepare_decoder_params."""
    return _decoder_forward_impl(x, conditions, prepped, out_dim)


def decoder_forward_ref(x, conditions, params):
    """Pure-JAX f32 reference (original module semantics, training-mode BN)."""
    h = jnp.concatenate([x, conditions], axis=-1).astype(jnp.float32)
    h = jnp.maximum(h @ params["w1"] + params["b1"], 0.0)
    h = _leaky_relu(h @ params["w2"] + params["b2"])
    h = _batchnorm_train(h, params["g2"], params["be2"])
    h = _leaky_relu(h @ params["w3"] + params["b3"])
    h = _batchnorm_train(h, params["g3"], params["be3"])
    h = _leaky_relu(h @ params["w4"] + params["b4"])
    h = _batchnorm_train(h, params["g4"], params["be4"])
    return h @ params["w5"] + params["b5"]


def decoder_forward_ref_bf16(x, conditions, params):
    """Reference with the kernel's bf16-MXU / f32-accumulate precision policy."""
    def mm(a, w):
        return jnp.dot(a.astype(jnp.bfloat16), w.astype(jnp.bfloat16),
                       preferred_element_type=jnp.float32)

    h = jnp.concatenate([x, conditions], axis=-1).astype(jnp.float32)
    h = jnp.maximum(mm(h, params["w1"]) + params["b1"], 0.0)
    h = _leaky_relu(mm(h, params["w2"]) + params["b2"])
    h = _batchnorm_train(h, params["g2"], params["be2"])
    h = _leaky_relu(mm(h, params["w3"]) + params["b3"])
    h = _batchnorm_train(h, params["g3"], params["be3"])
    h = _leaky_relu(mm(h, params["w4"]) + params["b4"])
    h = _batchnorm_train(h, params["g4"], params["be4"])
    return mm(h, params["w5"]) + params["b5"]


if __name__ == "__main__":
    # Small shapes consistent with the module: Decoder(ndf=68, nz=32, n_cond=4)
    nz, n_cond, ndf = 32, 4, 68
    batch = 8

    key = jax.random.PRNGKey(0)
    kx, kc, kp = jax.random.split(key, 3)
    x = jax.random.normal(kx, (batch, nz), jnp.float32)
    conditions = jax.random.normal(kc, (batch, n_cond), jnp.float32)
    params = make_decoder_params(nz, n_cond, ndf, kp)

    # One-time weight preparation (hoisted out of the per-call path).
    prepped, out_dim = prepare_decoder_params(params)
    prepped = jax.tree_util.tree_map(jax.block_until_ready, prepped)

    out = jax.block_until_ready(decoder_forward(x, conditions, prepped, out_dim))
    assert out.shape == (batch, ndf - n_cond), out.shape

    # Tight check vs. a reference using the identical bf16/f32 precision policy.
    ref_bf16 = jax.block_until_ready(decoder_forward_ref_bf16(x, conditions, params))
    np.testing.assert_allclose(np.asarray(out), np.asarray(ref_bf16),
                               rtol=2e-3, atol=2e-3)

    # Looser semantic check vs. the original full-f32 forward.
    ref_f32 = jax.block_until_ready(decoder_forward_ref(x, conditions, params))
    np.testing.assert_allclose(np.asarray(out), np.asarray(ref_f32),
                               rtol=1e-1, atol=1e-1)

    print("KERNEL_OK")
</pallas_src>

<mosaic_0001>
module attributes {stable_mosaic.version = 11 : i64} {
  func.func @kernel(%arg0: memref<16x128xbf16, #tpu.memory_space<vmem>>, %arg1: memref<128x128xbf16, #tpu.memory_space<vmem>>, %arg2: memref<128x128xbf16, #tpu.memory_space<vmem>>, %arg3: memref<128x256xbf16, #tpu.memory_space<vmem>>, %arg4: memref<256x512xbf16, #tpu.memory_space<vmem>>, %arg5: memref<512x128xbf16, #tpu.memory_space<vmem>>, %arg6: memref<11x512xf32, #tpu.memory_space<vmem>>, %arg7: memref<16x128xf32, #tpu.memory_space<vmem>>) attributes {dimension_semantics = [], scalar_prefetch = 0 : i64, scratch_operands = 0 : i64, tpu.core_type = #tpu.core_type<tc>} {
    %0 = tpu.iota {dimensions = array<i32: 0>} : vector<16x1xi32>
    %c8_i32 = arith.constant 8 : i32
    %1 = vector.broadcast %c8_i32 : i32 to vector<16x1xi32>
    %2 = arith.cmpi slt, %0, %1 : vector<16x1xi32>
    %3 = arith.extui %2 : vector<16x1xi1> to vector<16x1xi32>
    %4 = arith.sitofp %3 : vector<16x1xi32> to vector<16x1xf32>
    %c0 = arith.constant 0 : index
    %c0_0 = arith.constant 0 : index
    %5 = vector.load %arg0[%c0, %c0_0] : memref<16x128xbf16, #tpu.memory_space<vmem>>, vector<16x128xbf16>
    %c0_1 = arith.constant 0 : index
    %c0_2 = arith.constant 0 : index
    %6 = vector.load %arg1[%c0_1, %c0_2] : memref<128x128xbf16, #tpu.memory_space<vmem>>, vector<128x128xbf16>
    %cst = arith.constant dense<0.000000e+00> : vector<16x128xf32>
    %7 = tpu.matmul %5, %6, %cst {dimension_numbers = #tpu.dot_dimension_numbers<[1], [0], [0], [1], [0, 0, 1, 1], [], []>} : vector<16x128xbf16>, vector<128x128xbf16>, vector<16x128xf32> -> vector<16x128xf32>
    %c0_3 = arith.constant 0 : index
    %c0_4 = arith.constant 0 : index
    %8 = vector.load %arg6[%c0_3, %c0_4] : memref<11x512xf32, #tpu.memory_space<vmem>>, vector<1x128xf32>
    %9 = vector.broadcast %8 : vector<1x128xf32> to vector<16x128xf32>
    %10 = arith.addf %7, %9 : vector<16x128xf32>
    %cst_5 = arith.constant 0.000000e+00 : f32
    %11 = vector.broadcast %cst_5 : f32 to vector<16x128xf32>
    %12 = arith.maximumf %10, %11 : vector<16x128xf32>
    %13 = arith.truncf %12 : vector<16x128xf32> to vector<16x128xbf16>
    %c0_6 = arith.constant 0 : index
    %c0_7 = arith.constant 0 : index
    %14 = vector.load %arg2[%c0_6, %c0_7] : memref<128x128xbf16, #tpu.memory_space<vmem>>, vector<128x128xbf16>
    %cst_8 = arith.constant dense<0.000000e+00> : vector<16x128xf32>
    %15 = tpu.matmul %13, %14, %cst_8 {dimension_numbers = #tpu.dot_dimension_numbers<[1], [0], [0], [1], [0, 0, 1, 1], [], []>} : vector<16x128xbf16>, vector<128x128xbf16>, vector<16x128xf32> -> vector<16x128xf32>
    %c1 = arith.constant 1 : index
    %c0_9 = arith.constant 0 : index
    %16 = vector.load %arg6[%c1, %c0_9] : memref<11x512xf32, #tpu.memory_space<vmem>>, vector<1x128xf32>
    %17 = vector.broadcast %16 : vector<1x128xf32> to vector<16x128xf32>
    %18 = arith.addf %15, %17 : vector<16x128xf32>
    %cst_10 = arith.constant 0.000000e+00 : f32
    %19 = vector.broadcast %cst_10 : f32 to vector<16x128xf32>
    %20 = arith.cmpf ogt, %18, %19 : vector<16x128xf32>
    %cst_11 = arith.constant 2.000000e-01 : f32
    %21 = vector.broadcast %cst_11 : f32 to vector<16x128xf32>
    %22 = arith.mulf %21, %18 : vector<16x128xf32>
    %23 = arith.select %20, %18, %22 : vector<16x128xi1>, vector<16x128xf32>
    %c2 = arith.constant 2 : index
    %c0_12 = arith.constant 0 : index
    %24 = vector.load %arg6[%c2, %c0_12] : memref<11x512xf32, #tpu.memory_space<vmem>>, vector<1x128xf32>
    %c3 = arith.constant 3 : index
    %c0_13 = arith.constant 0 : index
    %25 = vector.load %arg6[%c3, %c0_13] : memref<11x512xf32, #tpu.memory_space<vmem>>, vector<1x128xf32>
    %26 = vector.broadcast %4 : vector<16x1xf32> to vector<16x128xf32>
    %27 = arith.mulf %23, %26 : vector<16x128xf32>
    %cst_14 = arith.constant dense<0.000000e+00> : vector<128xf32>
    %28 = vector.multi_reduction <add>, %27, %cst_14 [0] : vector<16x128xf32> to vector<128xf32>
    %29 = vector.shape_cast %28 : vector<128xf32> to vector<1x128xf32>
    %cst_15 = arith.constant 1.250000e-01 : f32
    %30 = vector.broadcast %cst_15 : f32 to vector<1x128xf32>
    %31 = arith.mulf %29, %30 : vector<1x128xf32>
    %32 = vector.broadcast %31 : vector<1x128xf32> to vector<16x128xf32>
    %33 = arith.subf %23, %32 : vector<16x128xf32>
    %34 = arith.mulf %33, %33 : vector<16x128xf32>
    %35 = vector.broadcast %4 : vector<16x1xf32> to vector<16x128xf32>
    %36 = arith.mulf %34, %35 : vector<16x128xf32>
    %cst_16 = arith.constant dense<0.000000e+00> : vector<128xf32>
    %37 = vector.multi_reduction <add>, %36, %cst_16 [0] : vector<16x128xf32> to vector<128xf32>
    %38 = vector.shape_cast %37 : vector<128xf32> to vector<1x128xf32>
    %cst_17 = arith.constant 1.250000e-01 : f32
    %39 = vector.broadcast %cst_17 : f32 to vector<1x128xf32>
    %40 = arith.mulf %38, %39 : vector<1x128xf32>
    %41 = vector.broadcast %24 : vector<1x128xf32> to vector<16x128xf32>
    %42 = arith.mulf %41, %33 : vector<16x128xf32>
    %cst_18 = arith.constant 9.99999974E-6 : f32
    %43 = vector.broadcast %cst_18 : f32 to vector<1x128xf32>
    %44 = arith.addf %40, %43 : vector<1x128xf32>
    %45 = math.rsqrt %44 : vector<1x128xf32>
    %46 = vector.broadcast %45 : vector<1x128xf32> to vector<16x128xf32>
    %47 = arith.mulf %42, %46 : vector<16x128xf32>
    %48 = vector.broadcast %25 : vector<1x128xf32> to vector<16x128xf32>
    %49 = arith.addf %47, %48 : vector<16x128xf32>
    %50 = arith.truncf %49 : vector<16x128xf32> to vector<16x128xbf16>
    %c0_19 = arith.constant 0 : index
    %c0_20 = arith.constant 0 : index
    %51 = vector.load %arg3[%c0_19, %c0_20] : memref<128x256xbf16, #tpu.memory_space<vmem>>, vector<128x256xbf16>
    %cst_21 = arith.constant dense<0.000000e+00> : vector<16x256xf32>
    %52 = tpu.matmul %50, %51, %cst_21 {dimension_numbers = #tpu.dot_dimension_numbers<[1], [0], [0], [1], [0, 0, 1, 1], [], []>} : vector<16x128xbf16>, vector<128x256xbf16>, vector<16x256xf32> -> vector<16x256xf32>
    %c4 = arith.constant 4 : index
    %c0_22 = arith.constant 0 : index
    %53 = vector.load %arg6[%c4, %c0_22] : memref<11x512xf32, #tpu.memory_space<vmem>>, vector<1x256xf32>
    %54 = vector.broadcast %53 : vector<1x256xf32> to vector<16x256xf32>
    %55 = arith.addf %52, %54 : vector<16x256xf32>
    %cst_23 = arith.constant 0.000000e+00 : f32
    %56 = vector.broadcast %cst_23 : f32 to vector<16x256xf32>
    %57 = arith.cmpf ogt, %55, %56 : vector<16x256xf32>
    %cst_24 = arith.constant 2.000000e-01 : f32
    %58 = vector.broadcast %cst_24 : f32 to vector<16x256xf32>
    %59 = arith.mulf %58, %55 : vector<16x256xf32>
    %60 = arith.select %57, %55, %59 : vector<16x256xi1>, vector<16x256xf32>
    %c5 = arith.constant 5 : index
    %c0_25 = arith.constant 0 : index
    %61 = vector.load %arg6[%c5, %c0_25] : memref<11x512xf32, #tpu.memory_space<vmem>>, vector<1x256xf32>
    %c6 = arith.constant 6 : index
    %c0_26 = arith.constant 0 : index
    %62 = vector.load %arg6[%c6, %c0_26] : memref<11x512xf32, #tpu.memory_space<vmem>>, vector<1x256xf32>
    %63 = vector.broadcast %4 : vector<16x1xf32> to vector<16x256xf32>
    %64 = arith.mulf %60, %63 : vector<16x256xf32>
    %cst_27 = arith.constant dense<0.000000e+00> : vector<256xf32>
    %65 = vector.multi_reduction <add>, %64, %cst_27 [0] : vector<16x256xf32> to vector<256xf32>
    %66 = vector.shape_cast %65 : vector<256xf32> to vector<1x256xf32>
    %cst_28 = arith.constant 1.250000e-01 : f32
    %67 = vector.broadcast %cst_28 : f32 to vector<1x256xf32>
    %68 = arith.mulf %66, %67 : vector<1x256xf32>
    %69 = vector.broadcast %68 : vector<1x256xf32> to vector<16x256xf32>
    %70 = arith.subf %60, %69 : vector<16x256xf32>
    %71 = arith.mulf %70, %70 : vector<16x256xf32>
    %72 = vector.broadcast %4 : vector<16x1xf32> to vector<16x256xf32>
    %73 = arith.mulf %71, %72 : vector<16x256xf32>
    %cst_29 = arith.constant dense<0.000000e+00> : vector<256xf32>
    %74 = vector.multi_reduction <add>, %73, %cst_29 [0] : vector<16x256xf32> to vector<256xf32>
    %75 = vector.shape_cast %74 : vector<256xf32> to vector<1x256xf32>
    %cst_30 = arith.constant 1.250000e-01 : f32
    %76 = vector.broadcast %cst_30 : f32 to vector<1x256xf32>
    %77 = arith.mulf %75, %76 : vector<1x256xf32>
    %78 = vector.broadcast %61 : vector<1x256xf32> to vector<16x256xf32>
    %79 = arith.mulf %78, %70 : vector<16x256xf32>
    %cst_31 = arith.constant 9.99999974E-6 : f32
    %80 = vector.broadcast %cst_31 : f32 to vector<1x256xf32>
    %81 = arith.addf %77, %80 : vector<1x256xf32>
    %82 = math.rsqrt %81 : vector<1x256xf32>
    %83 = vector.broadcast %82 : vector<1x256xf32> to vector<16x256xf32>
    %84 = arith.mulf %79, %83 : vector<16x256xf32>
    %85 = vector.broadcast %62 : vector<1x256xf32> to vector<16x256xf32>
    %86 = arith.addf %84, %85 : vector<16x256xf32>
    %87 = arith.truncf %86 : vector<16x256xf32> to vector<16x256xbf16>
    %c0_32 = arith.constant 0 : index
    %c0_33 = arith.constant 0 : index
    %88 = vector.load %arg4[%c0_32, %c0_33] : memref<256x512xbf16, #tpu.memory_space<vmem>>, vector<256x512xbf16>
    %cst_34 = arith.constant dense<0.000000e+00> : vector<16x512xf32>
    %89 = tpu.matmul %87, %88, %cst_34 {dimension_numbers = #tpu.dot_dimension_numbers<[1], [0], [0], [1], [0, 0, 1, 1], [], []>} : vector<16x256xbf16>, vector<256x512xbf16>, vector<16x512xf32> -> vector<16x512xf32>
    %c7 = arith.constant 7 : index
    %c0_35 = arith.constant 0 : index
    %90 = vector.load %arg6[%c7, %c0_35] : memref<11x512xf32, #tpu.memory_space<vmem>>, vector<1x512xf32>
    %91 = vector.broadcast %90 : vector<1x512xf32> to vector<16x512xf32>
    %92 = arith.addf %89, %91 : vector<16x512xf32>
    %cst_36 = arith.constant 0.000000e+00 : f32
    %93 = vector.broadcast %cst_36 : f32 to vector<16x512xf32>
    %94 = arith.cmpf ogt, %92, %93 : vector<16x512xf32>
    %cst_37 = arith.constant 2.000000e-01 : f32
    %95 = vector.broadcast %cst_37 : f32 to vector<16x512xf32>
    %96 = arith.mulf %95, %92 : vector<16x512xf32>
    %97 = arith.select %94, %92, %96 : vector<16x512xi1>, vector<16x512xf32>
    %c8 = arith.constant 8 : index
    %c0_38 = arith.constant 0 : index
    %98 = vector.load %arg6[%c8, %c0_38] : memref<11x512xf32, #tpu.memory_space<vmem>>, vector<1x512xf32>
    %c9 = arith.constant 9 : index
    %c0_39 = arith.constant 0 : index
    %99 = vector.load %arg6[%c9, %c0_39] : memref<11x512xf32, #tpu.memory_space<vmem>>, vector<1x512xf32>
    %100 = vector.broadcast %4 : vector<16x1xf32> to vector<16x512xf32>
    %101 = arith.mulf %97, %100 : vector<16x512xf32>
    %cst_40 = arith.constant dense<0.000000e+00> : vector<512xf32>
    %102 = vector.multi_reduction <add>, %101, %cst_40 [0] : vector<16x512xf32> to vector<512xf32>
    %103 = vector.shape_cast %102 : vector<512xf32> to vector<1x512xf32>
    %cst_41 = arith.constant 1.250000e-01 : f32
    %104 = vector.broadcast %cst_41 : f32 to vector<1x512xf32>
    %105 = arith.mulf %103, %104 : vector<1x512xf32>
    %106 = vector.broadcast %105 : vector<1x512xf32> to vector<16x512xf32>
    %107 = arith.subf %97, %106 : vector<16x512xf32>
    %108 = arith.mulf %107, %107 : vector<16x512xf32>
    %109 = vector.broadcast %4 : vector<16x1xf32> to vector<16x512xf32>
    %110 = arith.mulf %108, %109 : vector<16x512xf32>
    %cst_42 = arith.constant dense<0.000000e+00> : vector<512xf32>
    %111 = vector.multi_reduction <add>, %110, %cst_42 [0] : vector<16x512xf32> to vector<512xf32>
    %112 = vector.shape_cast %111 : vector<512xf32> to vector<1x512xf32>
    %cst_43 = arith.constant 1.250000e-01 : f32
    %113 = vector.broadcast %cst_43 : f32 to vector<1x512xf32>
    %114 = arith.mulf %112, %113 : vector<1x512xf32>
    %115 = vector.broadcast %98 : vector<1x512xf32> to vector<16x512xf32>
    %116 = arith.mulf %115, %107 : vector<16x512xf32>
    %cst_44 = arith.constant 9.99999974E-6 : f32
    %117 = vector.broadcast %cst_44 : f32 to vector<1x512xf32>
    %118 = arith.addf %114, %117 : vector<1x512xf32>
    %119 = math.rsqrt %118 : vector<1x512xf32>
    %120 = vector.broadcast %119 : vector<1x512xf32> to vector<16x512xf32>
    %121 = arith.mulf %116, %120 : vector<16x512xf32>
    %122 = vector.broadcast %99 : vector<1x512xf32> to vector<16x512xf32>
    %123 = arith.addf %121, %122 : vector<16x512xf32>
    %124 = arith.truncf %123 : vector<16x512xf32> to vector<16x512xbf16>
    %c0_45 = arith.constant 0 : index
    %c0_46 = arith.constant 0 : index
    %125 = vector.load %arg5[%c0_45, %c0_46] : memref<512x128xbf16, #tpu.memory_space<vmem>>, vector<512x128xbf16>
    %cst_47 = arith.constant dense<0.000000e+00> : vector<16x128xf32>
    %126 = tpu.matmul %124, %125, %cst_47 {dimension_numbers = #tpu.dot_dimension_numbers<[1], [0], [0], [1], [0, 0, 1, 1], [], []>} : vector<16x512xbf16>, vector<512x128xbf16>, vector<16x128xf32> -> vector<16x128xf32>
    %c10 = arith.constant 10 : index
    %c0_48 = arith.constant 0 : index
    %127 = vector.load %arg6[%c10, %c0_48] : memref<11x512xf32, #tpu.memory_space<vmem>>, vector<1x128xf32>
    %128 = vector.broadcast %127 : vector<1x128xf32> to vector<16x128xf32>
    %129 = arith.addf %126, %128 : vector<16x128xf32>
    %c0_49 = arith.constant 0 : index
    %c0_50 = arith.constant 0 : index
    %130 = vector.load %arg7[%c0_49, %c0_50] : memref<16x128xf32, #tpu.memory_space<vmem>>, vector<16x128xf32>
    tpu.vector_store %arg7[%c0_49, %c0_50], %129 {strides = array<i32>} : memref<16x128xf32, #tpu.memory_space<vmem>>, vector<16x128xf32>,
    return
  }
}

</mosaic_0001>

<bundles_post_ra>
// kernel: _decoder_forward_impl.1
= control target key start
LH: loop header
LB: loop body
LE: loop exit
PB: predicated region body
PF: predicated region fallthrough
CT: control target
= control target key end

     0   :  { %12 = vsyncpa [#allocation3], 0  ;;  %s2407_s0 = inlined_call_operand.vmem [shape: bf16[16,128], index: 0, kind: input, shape index: {}]   ;;  %s2408_s1 = inlined_call_operand.hbm [shape: bf16[128,128], index: 1, kind: input, shape index: {}]   ;;  %s2409_s2 = inlined_call_operand.hbm [shape: bf16[128,128], index: 2, kind: input, shape index: {}]   ;;  %s2410_s3 = inlined_call_operand.hbm [shape: bf16[128,256], index: 3, kind: input, shape index: {}]   ;;  %s2411_s4 = inlined_call_operand.hbm [shape: bf16[256,512], index: 4, kind: input, shape index: {}]   ;;  %s2412_s5 = inlined_call_operand.hbm [shape: bf16[512,128], index: 5, kind: input, shape index: {}]   ;;  %s2413_s6 = inlined_call_operand.hbm [shape: f32[11,512], index: 6, kind: input, shape index: {}]   ;;  %s2414_s7 = inlined_call_operand.vmem [shape: f32[16,128], index: 7, kind: output, shape index: {}]  }
   0x1   :  { %13 = vsyncpa [#allocation5], 0 }
   0x2   :  { %14 = vsyncpa [#allocation8], 0 }
   0x3   :  { %15 = vsyncpa [#allocation11], 0  ;;  %s2241_s24 = smov [#allocation4]   ;;  %s2242_s26 = smov [#allocation7]  }
   0x4   :  { %s35_s25 = sshll.u32 %s2241_s24, 4  ;;  %s59_s27 = sshll.u32 %s2242_s26, 4  ;;  %s36_s25 = int_to_ptr.vmem [resolvable:$true] %s35_s25  ;;  %s60_s27 = int_to_ptr.vmem [resolvable:$true] %s59_s27 }
   0x5   :  { %s2121_s28 = scalar_lea.vmem %s36_s25, 1024  ;;  %p2126_p1 = scmp.lt.s32.totalorder %s36_s25, %s36_s25 }
   0x6   :  { %p2122_p0 = scmp.ne.s32.totalorder %s36_s25, %s2121_s28  ;;  %p2127_p2 = scmp.lt.s32.totalorder %s2121_s28, %s2121_s28 }
   0x8   :  { %p2128_p3 = por %p2127_p2, %p2126_p1 }
   0xa   :  { %p2129_p4 = pnand %p2128_p3, %p2122_p0 }
   0xc   :  { %2132 = shalt.err (!%p2129_p4)
}
   0xd   :  { %s2243_s29 = smov 64   ;;  %s2244_s30 = smov 4  }
   0xe   :  { %41 = dma.hbm_to_vmem [thread:$0]  %s2409_s2, 1024, %s36_s25, [#allocation5], %s2243_s29, %s2243_s29, %s2244_s30  }
   0xf   :  { %s2141_s10 = scalar_lea.vmem %s60_s27, 8192  ;;  %p2146_p6 = scmp.lt.s32.totalorder %s60_s27, %s60_s27 }
  0x10   :  { %p2142_p5 = scmp.ne.s32.totalorder %s60_s27, %s2141_s10  ;;  %p2147_p7 = scmp.lt.s32.totalorder %s2141_s10, %s2141_s10 }
  0x12   :  { %p2148_p8 = por %p2147_p7, %p2146_p6 }
  0x14   :  { %p2149_p9 = pnand %p2148_p8, %p2142_p5 }
  0x16   :  { %2152 = shalt.err (!%p2149_p9)
}
  0x17   :  { %s2245_s11 = smov 256   ;;  %s2246_s12 = smov 16  }
  0x18   :  { %65 = dma.hbm_to_vmem [thread:$0]  %s2411_s4, 8192, %s60_s27, [#allocation8], %s2245_s11, %s2245_s11, %s2246_s12  }
  0x19   :  { %s2247_s15 = smov [#allocation2]   ;;  %s2248_s17 = smov [#allocation6]  }
  0x1a   :  { %s23_s16 = sshll.u32 %s2247_s15, 4  ;;  %s47_s18 = sshll.u32 %s2248_s17, 4  ;;  %s24_s16 = int_to_ptr.vmem [resolvable:$true] %s23_s16  ;;  %s48_s18 = int_to_ptr.vmem [resolvable:$true] %s47_s18 }
  0x1b   :  { %s2161_s2 = scalar_lea.vmem %s24_s16, 1024  ;;  %p2166_p11 = scmp.lt.s32.totalorder %s24_s16, %s24_s16 }
  0x1c   :  { %p2162_p10 = scmp.ne.s32.totalorder %s24_s16, %s2161_s2  ;;  %p2167_p12 = scmp.lt.s32.totalorder %s2161_s2, %s2161_s2 }
  0x1e   :  { %p2168_p13 = por %p2167_p12, %p2166_p11 }
  0x20   :  { %p2169_p0 = pnand %p2168_p13, %p2162_p10 }
  0x22   :  { %2172 = shalt.err (!%p2169_p0)
}
  0x23   :  { %29 = dma.hbm_to_vmem [thread:$0]  %s2408_s1, 1024, %s24_s16, [#allocation3], %s2243_s29, %s2243_s29, %s2244_s30  }
  0x24   :  { %s2181_s4 = scalar_lea.vmem %s48_s18, 2048  ;;  %p2186_p2 = scmp.lt.s32.totalorder %s48_s18, %s48_s18 }
  0x25   :  { %p2182_p1 = scmp.ne.s32.totalorder %s48_s18, %s2181_s4  ;;  %p2187_p3 = scmp.lt.s32.totalorder %s2181_s4, %s2181_s4 }
  0x27   :  { %p2188_p4 = por %p2187_p3, %p2186_p2 }
  0x29   :  { %p2189_p5 = pnand %p2188_p4, %p2182_p1 }
  0x2b   :  { %2192 = shalt.err (!%p2189_p5)
}
  0x2c   :  { %s2249_s21 = smov 128   ;;  %s2250_s22 = smov 8  }
  0x2d   :  { %53 = dma.hbm_to_vmem [thread:$0]  %s2410_s3, 2048, %s48_s18, [#allocation5], %s2249_s21, %s2249_s21, %s2250_s22  }
  0x2e   :  { %s2251_s25 = smov [#allocation9]   ;;  %s2252_s27 = smov [#allocation10]  }
  0x2f   :  { %s71_s26 = sshll.u32 %s2251_s25, 4  ;;  %s83_s28 = sshll.u32 %s2252_s27, 4  ;;  %s72_s26 = int_to_ptr.vmem [resolvable:$true] %s71_s26  ;;  %s84_s28 = int_to_ptr.vmem [resolvable:$true] %s83_s28 }
  0x30   :  { %s2201_s1 = scalar_lea.vmem %s72_s26, 4096  ;;  %p2206_p7 = scmp.lt.s32.totalorder %s72_s26, %s72_s26 }
  0x31   :  { %p2202_p6 = scmp.ne.s32.totalorder %s72_s26, %s2201_s1  ;;  %p2207_p8 = scmp.lt.s32.totalorder %s2201_s1, %s2201_s1 }
  0x33   :  { %p2208_p9 = por %p2207_p8, %p2206_p7 }
  0x35   :  { %p2209_p10 = pnand %p2208_p9, %p2202_p6 }
  0x37   :  { %2212 = shalt.err (!%p2209_p10)
}
  0x38   :  { %77 = dma.hbm_to_vmem [thread:$0]  %s2412_s5, 4096, %s72_s26, [#allocation8], %s2243_s29, %s2243_s29, %s2244_s30  }
  0x39   :  { %s2221_s3 = scalar_lea.vmem %s84_s28, 1024  ;;  %p2226_p12 = scmp.lt.s32.totalorder %s84_s28, %s84_s28 }
  0x3a   :  { %p2222_p11 = scmp.ne.s32.totalorder %s84_s28, %s2221_s3  ;;  %p2227_p13 = scmp.lt.s32.totalorder %s2221_s3, %s2221_s3 }
  0x3c   :  { %p2228_p0 = por %p2227_p13, %p2226_p12 }
  0x3e   :  { %p2229_p1 = pnand %p2228_p0, %p2222_p11 }
  0x40   :  { %2232 = shalt.err (!%p2229_p1)
}
  0x41   :  { %s2253_s10 = smov 512   ;;  %s2254_s11 = smov 32  }
  0x42   :  { %89 = dma.hbm_to_vmem [thread:$0]  %s2413_s6, 1024, %s84_s28, [#allocation11], %s2253_s10, %s2253_s10, %s2254_s11  }
  0x43   :  { %2233 = dma.done.wait [#allocation3], 1024  }
  0x44   :  { %2234 = vsyncadd [#allocation3], 4294966272 }
  0x45   :  { %2235 = dma.done.wait [#allocation5], 3072  }
  0x46   :  { %2236 = vsyncadd [#allocation5], 4294964224 }
  0x47   :  { %2237 = dma.done.wait [#allocation8], 12288  }
  0x48   :  { %2238 = vsyncadd [#allocation8], 4294955008 }
  0x49   :  { %2239 = dma.done.wait [#allocation11], 1024  }
  0x4a   :  { %2240 = vsyncadd [#allocation11], 4294966272  ;;  %v2255_v0 = vmov 0.0   ;;  %vm2256_vm0 = vmmov 0   ;;  %v1930_v1 = vld [vmem:[#allocation2 + $0x38] sm:$0xff]   ;;  %v1931_v2 = vld [vmem:[#allocation2 + $0x30] sm:$0xff]  }
  0x4b   :  { %1873 = vmatprep.subr.bf16.mxu0 %v2255_v0  ;;  %1889 = vmatprep.mubr.msk.bf16.mxu0 %vm2256_vm0, %v2255_v0  ;;  %v1932_v3 = vld [vmem:[#allocation2 + $0x28] sm:$0xff]   ;;  %v1939_v4 = vld [vmem:[#allocation4 + $0x38] sm:$0xff]   ;;  %v1933_v5 = vld [vmem:[#allocation2 + $0x20] sm:$0xff]   ;;  %v2257_v44 = vmov 0  }
  0x4c   :  { %1893 = vmatprep.subr.bf16.mxu1 %v2255_v0  ;;  %1909 = vmatprep.mubr.msk.bf16.mxu1 %vm2256_vm0, %v2255_v0  ;;  %v1940_v6 = vld [vmem:[#allocation4 + $0x30] sm:$0xff]   ;;  %v1934_v7 = vld [vmem:[#allocation2 + $0x18] sm:$0xff]   ;;  %v1941_v8 = vld [vmem:[#allocation4 + $0x28] sm:$0xff]  }
  0x4d   :  { %1874 = vmatpush3.bf16.msra.mxu0 %v1930_v1  ;;  %1894 = vmatpush3.bf16.msra.mxu1 %v1939_v4  ;;  %v1935_v9 = vld [vmem:[#allocation2 + $0x10] sm:$0xff]   ;;  %v1942_v10 = vld [vmem:[#allocation4 + $0x20] sm:$0xff]   ;;  %v1936_v11 = vld [vmem:[#allocation2 + $0x8] sm:$0xff]  }
  0x4e   :  { %1875 = vmatprep.subr.bf16.mxu0 %v2255_v0  ;;  %1895 = vmatprep.subr.bf16.mxu1 %v2255_v0  ;;  %v1943_v12 = vld [vmem:[#allocation4 + $0x18] sm:$0xff]   ;;  %v1937_v13 = vld [vmem:[#allocation2] sm:$0xff]   ;;  %v1944_v15 = vld [vmem:[#allocation4 + $0x10] sm:$0xff]  }
  0x4f   :  { %v1938_v14 = vld [vmem:[%s2407_s0] sm:$0xff]   ;;  %v1945_v16 = vld [vmem:[#allocation4 + $0x8] sm:$0xff]   ;;  %v1949_v28 = vld [vmem:[#allocation6 + $0x74] ss:$8 sps:$4 sm:$0xff]  }
  0x50   :  { %v1946_v17 = vld [vmem:[#allocation4] sm:$0xff]   ;;  %v1947_v29 = vld [vmem:[#allocation6 + $0x70] ss:$8 sps:$4 sm:$0xff]   ;;  %v1955_v32 = vld [vmem:[#allocation6 + $0x54] ss:$8 sps:$4 sm:$0xff]  }
  0x51   :  { %1876 = vmatpush3.bf16.msra.mxu0 %v1931_v2  ;;  %1896 = vmatpush3.bf16.msra.mxu1 %v1940_v6  ;;  %v136_v18 = vld [vmem:[#allocation10] ss:$0 sm:$0xff]  ;;  %v1952_v30 = vld [vmem:[#allocation6 + $0x64] ss:$8 sps:$4 sm:$0xff]   ;;  %v1953_v33 = vld [vmem:[#allocation6 + $0x50] ss:$8 sps:$4 sm:$0xff]  }
  0x52   :  { %1877 = vmatprep.subr.bf16.mxu0 %v2255_v0  ;;  %1897 = vmatprep.subr.bf16.mxu1 %v2255_v0  ;;  %v1950_v31 = vld [vmem:[#allocation6 + $0x60] ss:$8 sps:$4 sm:$0xff]   ;;  %v1958_v34 = vld [vmem:[#allocation6 + $0x44] ss:$8 sps:$4 sm:$0xff]   ;;  %v1961_v36 = vld [vmem:[#allocation6 + $0x34] ss:$8 sps:$4 sm:$0xff]  }
  0x53   :  { %v1956_v35 = vld [vmem:[#allocation6 + $0x40] ss:$8 sps:$4 sm:$0xff]   ;;  %v1959_v37 = vld [vmem:[#allocation6 + $0x30] ss:$8 sps:$4 sm:$0xff]   ;;  %v1964_v38 = vld [vmem:[#allocation6 + $0x24] ss:$8 sps:$4 sm:$0xff]  }
  0x54   :  { %v1962_v39 = vld [vmem:[#allocation6 + $0x20] ss:$8 sps:$4 sm:$0xff]   ;;  %v1967_v40 = vld [vmem:[#allocation6 + $0x14] ss:$8 sps:$4 sm:$0xff]   ;;  %v1965_v41 = vld [vmem:[#allocation6 + $0x10] ss:$8 sps:$4 sm:$0xff]  }
  0x55   :  { %1878 = vmatpush3.bf16.msra.mxu0 %v1932_v3  ;;  %1898 = vmatpush3.bf16.msra.mxu1 %v1941_v8  ;;  %v1968_v42 = vld [vmem:[#allocation6] ss:$8 sps:$4 sm:$0xff]   ;;  %v1970_v43 = vld [vmem:[#allocation6 + $0x4] ss:$8 sps:$4 sm:$0xff]  }
  0x56   :  { %1879 = vmatprep.subr.bf16.mxu0 %v2255_v0  ;;  %1899 = vmatprep.subr.bf16.mxu1 %v2255_v0  ;;  %v251_v45 = vld [vmem:[#allocation10 + $0x1] ss:$0 sm:$0xff] }
  0x59   :  { %1880 = vmatpush3.bf16.msra.mxu0 %v1933_v5  ;;  %1900 = vmatpush3.bf16.msra.mxu1 %v1942_v10 }
  0x5a   :  { %1881 = vmatprep.subr.bf16.mxu0 %v2255_v0  ;;  %1901 = vmatprep.subr.bf16.mxu1 %v2255_v0 }
  0x5d   :  { %1882 = vmatpush3.bf16.msra.mxu0 %v1934_v7  ;;  %1902 = vmatpush3.bf16.msra.mxu1 %v1943_v12 }
  0x5e   :  { %1883 = vmatprep.subr.bf16.mxu0 %v2255_v0  ;;  %1903 = vmatprep.subr.bf16.mxu1 %v2255_v0 }
  0x61   :  { %1884 = vmatpush3.bf16.msra.mxu0 %v1935_v9  ;;  %1904 = vmatpush3.bf16.msra.mxu1 %v1944_v15  ;;  %v347_v15 = vld [vmem:[#allocation10 + $0x2] ss:$0 sm:$0xff] }
  0x62   :  { %1885 = vmatprep.subr.bf16.mxu0 %v2255_v0  ;;  %1905 = vmatprep.subr.bf16.mxu1 %v2255_v0 }
  0x65   :  { %1886 = vmatpush3.bf16.msra.mxu0 %v1936_v11  ;;  %1906 = vmatpush3.bf16.msra.mxu1 %v1945_v16 }
  0x66   :  { %1887 = vmatprep.subr.bf16.mxu0 %v2255_v0  ;;  %1907 = vmatprep.subr.bf16.mxu1 %v2255_v0 }
  0x69   :  { %1888 = vmatpush3.bf16.msra.mxu0 %v1937_v13  ;;  %1908 = vmatpush3.bf16.msra.mxu1 %v1946_v17 }
  0x6a   :  { %491 = vmatprep.subr.bf16.mxu0 %v1949_v28  ;;  %v1974_v28 = vld [vmem:[#allocation7 + $0xe8] ss:$16 sps:$4 sm:$0xff]  }
  0x6c   :  { %1890 = vmatmul.mubr.bf16.vlgmr.msra.gmra.mxu0 %v1938_v14 }
  0x6d   :  { %492 = vmatpush1.bf16.msra.mxu0 %v1947_v29  ;;  %523 = vmatprep.mubr.bf16.mxu0 %v2257_v44  ;;  %v1979_v29 = vld [vmem:[#allocation7 + $0xc4] ss:$16 sps:$4 sm:$0xff]   ;;  %v1998_v44 = vld [vmem:[#allocation7 + $0x68] ss:$16 sps:$4 sm:$0xff]  }
  0x6e   :  { %493 = vmatprep.subr.bf16.mxu0 %v1952_v30  ;;  %v1982_v30 = vld [vmem:[#allocation7 + $0xcc] ss:$16 sps:$4 sm:$0xff]  }
  0x71   :  { %494 = vmatpush1.bf16.msra.mxu0 %v1950_v31  ;;  %v1977_v31 = vld [vmem:[#allocation7 + $0xc0] ss:$16 sps:$4 sm:$0xff]  }
  0x72   :  { %495 = vmatprep.subr.bf16.mxu0 %v1955_v32  ;;  %v1980_v32 = vld [vmem:[#allocation7 + $0xc8] ss:$16 sps:$4 sm:$0xff]  }
  0x75   :  { %496 = vmatpush1.bf16.msra.mxu0 %v1953_v33  ;;  %v1985_v33 = vld [vmem:[#allocation7 + $0xa4] ss:$16 sps:$4 sm:$0xff]  }
  0x76   :  { %497 = vmatprep.subr.bf16.mxu0 %v1958_v34  ;;  %v1988_v34 = vld [vmem:[#allocation7 + $0xac] ss:$16 sps:$4 sm:$0xff]  }
  0x79   :  { %498 = vmatpush1.bf16.msra.mxu0 %v1956_v35  ;;  %v1983_v35 = vld [vmem:[#allocation7 + $0xa0] ss:$16 sps:$4 sm:$0xff]  }
  0x7a   :  { %499 = vmatprep.subr.bf16.mxu0 %v1961_v36  ;;  %v1986_v36 = vld [vmem:[#allocation7 + $0xa8] ss:$16 sps:$4 sm:$0xff]  }
  0x7d   :  { %500 = vmatpush1.bf16.msra.mxu0 %v1959_v37  ;;  %v1991_v37 = vld [vmem:[#allocation7 + $0x84] ss:$16 sps:$4 sm:$0xff]  }
  0x7e   :  { %501 = vmatprep.subr.bf16.mxu0 %v1964_v38  ;;  %v1994_v38 = vld [vmem:[#allocation7 + $0x8c] ss:$16 sps:$4 sm:$0xff]  }
  0x81   :  { %502 = vmatpush1.bf16.msra.mxu0 %v1962_v39  ;;  %v1989_v39 = vld [vmem:[#allocation7 + $0x80] ss:$16 sps:$4 sm:$0xff]  }
  0x82   :  { %503 = vmatprep.subr.bf16.mxu0 %v1967_v40  ;;  %v1992_v40 = vld [vmem:[#allocation7 + $0x88] ss:$16 sps:$4 sm:$0xff]  }
  0x85   :  { %504 = vmatpush1.bf16.msra.mxu0 %v1965_v41  ;;  %v1997_v41 = vld [vmem:[#allocation7 + $0x64] ss:$16 sps:$4 sm:$0xff]  }
  0x86   :  { %505 = vmatprep.subr.bf16.mxu0 %v1970_v43  ;;  %v1995_v43 = vld [vmem:[#allocation7 + $0x60] ss:$16 sps:$4 sm:$0xff]  }
  0x89   :  { %506 = vmatpush1.bf16.msra.mxu0 %v1968_v42  ;;  %v2000_v42 = vld [vmem:[#allocation7 + $0x6c] ss:$16 sps:$4 sm:$0xff]  }
 0x12c   :  { %v225_v19 = vpop.f32.mrf.mxu0 }
 0x12d   :  { %v226_v21 = vadd.f32 %v225_v19, %v136_v18  ;;  %v348_v19 = vld [vmem:[#allocation10 + $0x3] ss:$0 sm:$0xff] }
 0x12e   :  { %v1891_v20 = vpop.f32.mrf.mxu0 }
 0x12f   :  { %v232_v25 = vmax.f32 %v226_v21, 0.0 }
 0x130   :  { %v228_v22 = vpop.f32.mrf.mxu0 }
 0x131   :  { %v229_v23 = vadd.f32 %v228_v22, %v136_v18 }
 0x132   :  { %v1892_v24 = vpop.f32.mrf.mxu0 }
 0x133   :  { %v233_v26 = vmax.f32 %v229_v23, 0.0 }
 0x135   :  { %v234_v27 = vpack.c.bf16 %v233_v26, %v232_v25  ;;  %v1973_v25 = vld [vmem:[#allocation7 + $0xe4] ss:$16 sps:$4 sm:$0xff]   ;;  %v1976_v26 = vld [vmem:[#allocation7 + $0xec] ss:$16 sps:$4 sm:$0xff]  }
 0x136   :  { %1045 = vmatprep.subr.bf16.mxu1 %v1973_v25  ;;  %1088 = vmatprep.subr.bf16.mxu0 %v1976_v26  ;;  %v401_v25 = vlaneseq }
 0x137   :  { %1910 = vmatmul.mubr.bf16.vlgmr.msra.gmra.mxu1 %v234_v27  ;;  %v1971_v27 = vld [vmem:[#allocation7 + $0xe0] ss:$16 sps:$4 sm:$0xff]  }
 0x138   :  { %1046 = vmatpush1.bf16.msra.mxu1 %v1971_v27  ;;  %v2328_v26 = vshrl.u32 %v401_v25, 7 }
 0x139   :  { %1047 = vmatprep.subr.bf16.mxu1 %v1979_v29 }
 0x13a   :  { %v2331_v27 = vsub.s32 0, %v2328_v26  ;;  %v2334_v29 = vsub.s32 1, %v2328_v26 }
 0x13c   :  { %1048 = vmatpush1.bf16.msra.mxu1 %v1977_v31 }
 0x13d   :  { %1049 = vmatprep.subr.bf16.mxu1 %v1985_v33 }
 0x140   :  { %1050 = vmatpush1.bf16.msra.mxu1 %v1983_v35 }
 0x141   :  { %1051 = vmatprep.subr.bf16.mxu1 %v1991_v37 }
 0x144   :  { %1052 = vmatpush1.bf16.msra.mxu1 %v1989_v39 }
 0x145   :  { %1053 = vmatprep.subr.bf16.mxu1 %v1997_v41 }
 0x148   :  { %1054 = vmatpush1.bf16.msra.mxu1 %v1995_v43 }
 0x1f7   :  { %v334_v46 = vpop.f32.mrf.mxu1 }
 0x1f8   :  { %v335_v48 = vadd.f32 %v334_v46, %v251_v45  ;;  %v2006_v46 = vld [vmem:[#allocation7 + $0x4c] ss:$16 sps:$4 sm:$0xff]  }
 0x1f9   :  { %v1911_v47 = vpop.f32.mrf.mxu1 }
 0x1fa   :  { %v343_v52 = vmul.f32 0.2, %v335_v48  ;;  %vm341_vm2 = vcmp.gt.f32.partialorder %v335_v48, 0.0  ;;  %v2001_v47 = vld [vmem:[#allocation7 + $0x40] ss:$16 sps:$4 sm:$0xff]  }
 0x1fb   :  { %v337_v49 = vpop.f32.mrf.mxu1 }
 0x1fc   :  { %v338_v50 = vadd.f32 %v337_v49, %v251_v45  ;;  %v345_v56 = vsel %vm341_vm2, %v335_v48, %v343_v52  ;;  %v2003_v45 = vld [vmem:[#allocation7 + $0x44] ss:$16 sps:$4 sm:$0xff]   ;;  %v2004_v48 = vld [vmem:[#allocation7 + $0x48] ss:$16 sps:$4 sm:$0xff]  }
 0x1fd   :  { %v1912_v51 = vpop.f32.mrf.mxu1  ;;  %1055 = vmatprep.subr.bf16.mxu1 %v2003_v45  ;;  %v2009_v49 = vld [vmem:[#allocation7 + $0x24] ss:$16 sps:$4 sm:$0xff]   ;;  %v2010_v52 = vld [vmem:[#allocation7 + $0x28] ss:$16 sps:$4 sm:$0xff]  }
 0x1fe   :  { %vm342_vm1 = vcmp.gt.f32.partialorder %v338_v50, 0.0  ;;  %v344_v53 = vmul.f32 0.2, %v338_v50  ;;  %1056 = vmatpush1.bf16.msra.mxu1 %v2001_v47  ;;  %v2007_v51 = vld [vmem:[#allocation7 + $0x20] ss:$16 sps:$4 sm:$0xff]  }
 0x1ff   :  { %1057 = vmatprep.subr.bf16.mxu1 %v2009_v49 }
 0x200   :  { %v346_v54 = vsel %vm342_vm1, %v338_v50, %v344_v53  ;;  %v2012_v50 = vld [vmem:[#allocation7 + $0x2c] ss:$16 sps:$4 sm:$0xff]   ;;  %v2015_v53 = vld [vmem:[#allocation7 + $0x4] ss:$16 sps:$4 sm:$0xff]  }
 0x201   :  { %v350_v55 = vmul.f32 0.0, %v346_v54 }
 0x202   :  { %1058 = vmatpush1.bf16.msra.mxu1 %v2007_v51 }
 0x203   :  { %v351_v57 = vadd.f32 %v350_v55, %v345_v56  ;;  %v2013_v55 = vld [vmem:[#allocation7] ss:$16 sps:$4 sm:$0xff]   ;;  %1059 = vmatprep.subr.bf16.mxu1 %v2015_v53 }
 0x205   :  { %v352_v58 = vrot.slane %v351_v57, 4 }
 0x206   :  { %1060 = vmatpush1.bf16.msra.mxu1 %v2013_v55 }
 0x207   :  { %v353_v59 = vadd.f32 %v352_v58, %v351_v57  ;;  %v2021_v57 = vld [vmem:[#allocation7 + $0x1e4] ss:$16 sps:$4 sm:$0xff]   ;;  %v2024_v58 = vld [vmem:[#allocation7 + $0x1ec] ss:$16 sps:$4 sm:$0xff]  }
 0x208   :  { %1061 = vmatprep.subr.bf16.mxu1 %v2021_v57 }
 0x209   :  { %v354_v60 = vrot.slane %v353_v59, 2 }
 0x20b   :  { %v355_v61 = vadd.f32 %v354_v60, %v353_v59  ;;  %v2019_v59 = vld [vmem:[#allocation7 + $0x1e0] ss:$16 sps:$4 sm:$0xff]   ;;  %v2022_v60 = vld [vmem:[#allocation7 + $0x1e8] ss:$16 sps:$4 sm:$0xff]  }
 0x20c   :  { %1062 = vmatpush2.bf16.msra.mxu1 %v2019_v59 }
 0x20d   :  { %v356_v62 = vrot.slane %v355_v61, 1 }
 0x20f   :  { %v357_v63 = vadd.f32 %v356_v62, %v355_v61  ;;  %v2027_v61 = vld [vmem:[#allocation7 + $0x1c4] ss:$16 sps:$4 sm:$0xff]   ;;  %v2030_v62 = vld [vmem:[#allocation7 + $0x1cc] ss:$16 sps:$4 sm:$0xff]  }
 0x210   :  { %1063 = vmatprep.subr.bf16.mxu1 %v2027_v61 }
 0x211   :  { %v358_v0 = vmul.f32 0.125, %v357_v63  ;;  %v2025_v63 = vld [vmem:[#allocation7 + $0x1c0] ss:$16 sps:$4 sm:$0xff]  }
 0x212   :  { %1064 = vmatpush2.bf16.msra.mxu1 %v2025_v63 }
 0x213   :  { %v359_v1 = vsub.f32 %v345_v56, %v358_v0  ;;  %v360_v2 = vsub.f32 %v346_v54, %v358_v0  ;;  %v2018_v54 = vld [vmem:[#allocation7 + $0xc] ss:$16 sps:$4 sm:$0xff]   ;;  %v2016_v56 = vld [vmem:[#allocation7 + $0x8] ss:$16 sps:$4 sm:$0xff]  }
 0x214   :  { %v2028_v0 = vld [vmem:[#allocation7 + $0x1c8] ss:$16 sps:$4 sm:$0xff]  }
 0x215   :  { %v362_v3 = vmul.f32 %v360_v2, %v360_v2  ;;  %v361_v4 = vmul.f32 %v359_v1, %v359_v1  ;;  %v373_v16 = vmul.f32 %v359_v1, %v347_v15  ;;  %v374_v17 = vmul.f32 %v360_v2, %v347_v15  ;;  %v2033_v1 = vld [vmem:[#allocation7 + $0x1a4] ss:$16 sps:$4 sm:$0xff]   ;;  %v2036_v2 = vld [vmem:[#allocation7 + $0x1ac] ss:$16 sps:$4 sm:$0xff]   ;;  %v2049_v15 = vld [vmem:[#allocation7 + $0x140] ss:$16 sps:$4 sm:$0xff]  }
 0x216   :  { %1065 = vmatprep.subr.bf16.mxu1 %v2033_v1 }
 0x217   :  { %v364_v5 = vmul.f32 0.0, %v362_v3  ;;  %v2031_v3 = vld [vmem:[#allocation7 + $0x1a0] ss:$16 sps:$4 sm:$0xff]  }
 0x218   :  { %1066 = vmatpush2.bf16.msra.mxu1 %v2031_v3 }
 0x219   :  { %v365_v6 = vadd.f32 %v364_v5, %v361_v4  ;;  %v2034_v4 = vld [vmem:[#allocation7 + $0x1a8] ss:$16 sps:$4 sm:$0xff]   ;;  %v2039_v5 = vld [vmem:[#allocation7 + $0x184] ss:$16 sps:$4 sm:$0xff]  }
 0x21a   :  { %1067 = vmatprep.subr.bf16.mxu1 %v2039_v5 }
 0x21b   :  { %v366_v7 = vrot.slane %v365_v6, 4 }
 0x21d   :  { %v367_v8 = vadd.f32 %v366_v7, %v365_v6  ;;  %v2042_v6 = vld [vmem:[#allocation7 + $0x18c] ss:$16 sps:$4 sm:$0xff]   ;;  %v2037_v7 = vld [vmem:[#allocation7 + $0x180] ss:$16 sps:$4 sm:$0xff]  }
 0x21e   :  { %1068 = vmatpush2.bf16.msra.mxu1 %v2037_v7 }
 0x21f   :  { %v368_v9 = vrot.slane %v367_v8, 2 }
 0x221   :  { %v369_v10 = vadd.f32 %v368_v9, %v367_v8  ;;  %v2040_v8 = vld [vmem:[#allocation7 + $0x188] ss:$16 sps:$4 sm:$0xff]   ;;  %v2045_v9 = vld [vmem:[#allocation7 + $0x164] ss:$16 sps:$4 sm:$0xff]  }
 0x222   :  { %1069 = vmatprep.subr.bf16.mxu1 %v2045_v9 }
 0x223   :  { %v370_v11 = vrot.slane %v369_v10, 1 }
 0x225   :  { %v371_v12 = vadd.f32 %v370_v11, %v369_v10  ;;  %v2048_v10 = vld [vmem:[#allocation7 + $0x16c] ss:$16 sps:$4 sm:$0xff]   ;;  %v2043_v11 = vld [vmem:[#allocation7 + $0x160] ss:$16 sps:$4 sm:$0xff]  }
 0x226   :  { %1070 = vmatpush2.bf16.msra.mxu1 %v2043_v11 }
 0x227   :  { %v372_v13 = vmul.f32 0.125, %v371_v12  ;;  %v2046_v12 = vld [vmem:[#allocation7 + $0x168] ss:$16 sps:$4 sm:$0xff]  }
 0x229   :  { %v375_v14 = vadd.f32 1e-05, %v372_v13  ;;  %v2051_v13 = vld [vmem:[#allocation7 + $0x144] ss:$16 sps:$4 sm:$0xff]  }
 0x22a   :  { %1071 = vmatprep.subr.bf16.mxu1 %v2051_v13 }
 0x22b   :  { %2099 = vrsqrt.f32 %v375_v14  ;;  %v2054_v14 = vld [vmem:[#allocation7 + $0x14c] ss:$16 sps:$4 sm:$0xff]   ;;  %1072 = vmatpush2.bf16.msra.mxu1 %v2049_v15 }
 0x238   :  { %v2100_v18 = vpop.eup %2099 }
 0x239   :  { %v378_v20 = vmul.f32 %v2100_v18, %v374_v17  ;;  %v377_v21 = vmul.f32 %v2100_v18, %v373_v16  ;;  %v2052_v16 = vld [vmem:[#allocation7 + $0x148] ss:$16 sps:$4 sm:$0xff]   ;;  %v2055_v17 = vld [vmem:[#allocation7 + $0x120] ss:$16 sps:$4 sm:$0xff]   ;;  %v2057_v18 = vld [vmem:[#allocation7 + $0x124] ss:$16 sps:$4 sm:$0xff]  }
 0x23a   :  { %1073 = vmatprep.subr.bf16.mxu1 %v2057_v18 }
 0x23b   :  { %v379_v22 = vadd.f32 %v377_v21, %v348_v19  ;;  %v380_v23 = vadd.f32 %v378_v20, %v348_v19  ;;  %v2058_v19 = vld [vmem:[#allocation7 + $0x128] ss:$16 sps:$4 sm:$0xff]   ;;  %v2060_v20 = vld [vmem:[#allocation7 + $0x12c] ss:$16 sps:$4 sm:$0xff]   ;;  %v2063_v21 = vld [vmem:[#allocation7 + $0x104] ss:$16 sps:$4 sm:$0xff]   ;;  %1074 = vmatpush2.bf16.msra.mxu1 %v2055_v17 }
 0x23c   :  { %1075 = vmatprep.subr.bf16.mxu1 %v2063_v21 }
 0x23d   :  { %v381_v24 = vpack.c.bf16 %v380_v23, %v379_v22  ;;  %v2066_v22 = vld [vmem:[#allocation7 + $0x10c] ss:$16 sps:$4 sm:$0xff]   ;;  %v2061_v23 = vld [vmem:[#allocation7 + $0x100] ss:$16 sps:$4 sm:$0xff]  }
 0x23f   :  { %524 = vmatmul.mubr.bf16.vlgmr.msra.gmra.mxu0 %v381_v24  ;;  %v2064_v24 = vld [vmem:[#allocation7 + $0x108] ss:$16 sps:$4 sm:$0xff]   ;;  %1076 = vmatpush2.bf16.msra.mxu1 %v2061_v23 }
 0x240   :  { %1089 = vmatpush1.bf16.msra.mxu0 %v1974_v28  ;;  %v399_v28 = vld [vmem:[#allocation10 + $0x4] ss:$8 sm:$0x3] }
 0x241   :  { %1090 = vmatprep.subr.bf16.mxu0 %v1982_v30  ;;  %v404_v30 = vrot.slane %v399_v28, %v2331_v27 }
 0x244   :  { %1091 = vmatpush1.bf16.msra.mxu0 %v1980_v32  ;;  %v408_v32 = vrot.slane %v399_v28, %v2334_v29 }
 0x245   :  { %1092 = vmatprep.subr.bf16.mxu0 %v1988_v34 }
 0x248   :  { %1093 = vmatpush1.bf16.msra.mxu0 %v1986_v36 }
 0x249   :  { %1094 = vmatprep.subr.bf16.mxu0 %v1994_v38 }
 0x24c   :  { %1095 = vmatpush1.bf16.msra.mxu0 %v1992_v40 }
 0x24d   :  { %1096 = vmatprep.subr.bf16.mxu0 %v2000_v42 }
 0x250   :  { %1097 = vmatpush1.bf16.msra.mxu0 %v1998_v44 }
 0x251   :  { %1098 = vmatprep.subr.bf16.mxu0 %v2006_v46 }
 0x254   :  { %1099 = vmatpush1.bf16.msra.mxu0 %v2004_v48 }
 0x255   :  { %1100 = vmatprep.subr.bf16.mxu0 %v2012_v50 }
 0x258   :  { %1101 = vmatpush1.bf16.msra.mxu0 %v2010_v52 }
 0x259   :  { %1102 = vmatprep.subr.bf16.mxu0 %v2018_v54 }
 0x25c   :  { %1103 = vmatpush1.bf16.msra.mxu0 %v2016_v56 }
 0x25d   :  { %1104 = vmatprep.subr.bf16.mxu0 %v2024_v58 }
 0x260   :  { %1105 = vmatpush2.bf16.msra.mxu0 %v2022_v60 }
 0x261   :  { %1106 = vmatprep.subr.bf16.mxu0 %v2030_v62 }
 0x264   :  { %1107 = vmatpush2.bf16.msra.mxu0 %v2028_v0 }
 0x265   :  { %1108 = vmatprep.subr.bf16.mxu0 %v2036_v2 }
 0x268   :  { %1109 = vmatpush2.bf16.msra.mxu0 %v2034_v4 }
 0x269   :  { %1110 = vmatprep.subr.bf16.mxu0 %v2042_v6 }
 0x26c   :  { %1111 = vmatpush2.bf16.msra.mxu0 %v2040_v8 }
 0x26d   :  { %1112 = vmatprep.subr.bf16.mxu0 %v2048_v10 }
 0x270   :  { %1113 = vmatpush2.bf16.msra.mxu0 %v2046_v12 }
 0x271   :  { %1114 = vmatprep.subr.bf16.mxu0 %v2054_v14 }
 0x274   :  { %1115 = vmatpush2.bf16.msra.mxu0 %v2052_v16 }
 0x275   :  { %1116 = vmatprep.subr.bf16.mxu0 %v2060_v20 }
 0x278   :  { %1117 = vmatpush2.bf16.msra.mxu0 %v2058_v19 }
 0x279   :  { %1118 = vmatprep.subr.bf16.mxu0 %v2066_v22 }
 0x27c   :  { %1119 = vmatpush2.bf16.msra.mxu0 %v2064_v24 }
 0x2ff   :  { %v525_v31 = vpop.f32.mrf.mxu0 }
 0x300   :  { %v526_v34 = vadd.f32 %v525_v31, %v404_v30 }
 0x301   :  { %v527_v33 = vpop.f32.mrf.mxu0 }
 0x302   :  { %v528_v36 = vadd.f32 %v527_v33, %v408_v32  ;;  %v538_v39 = vmul.f32 0.2, %v526_v34  ;;  %vm534_vm4 = vcmp.gt.f32.partialorder %v526_v34, 0.0  ;;  %v547_v33 = vld [vmem:[#allocation10 + $0x5] ss:$8 sm:$0x3] }
 0x303   :  { %v529_v35 = vpop.f32.mrf.mxu0 }
 0x304   :  { %v530_v37 = vadd.f32 %v529_v35, %v404_v30  ;;  %v539_v42 = vmul.f32 0.2, %v528_v36  ;;  %vm535_vm6 = vcmp.gt.f32.partialorder %v528_v36, 0.0  ;;  %v542_v46 = vsel %vm534_vm4, %v526_v34, %v538_v39 }
 0x305   :  { %v531_v38 = vpop.f32.mrf.mxu0  ;;  %v602_v34 = vrot.slane %v547_v33, %v2331_v27  ;;  %v606_v35 = vrot.slane %v547_v33, %v2334_v29 }
 0x306   :  { %vm536_vm3 = vcmp.gt.f32.partialorder %v530_v37, 0.0  ;;  %v540_v40 = vmul.f32 0.2, %v530_v37  ;;  %v532_v41 = vadd.f32 %v531_v38, %v408_v32  ;;  %v543_v50 = vsel %vm535_vm6, %v528_v36, %v539_v42  ;;  %v549_v36 = vld [vmem:[#allocation10 + $0x6] ss:$8 sm:$0x3] }
 0x308   :  { %v544_v43 = vsel %vm536_vm3, %v530_v37, %v540_v40  ;;  %vm537_vm5 = vcmp.gt.f32.partialorder %v532_v41, 0.0  ;;  %v541_v44 = vmul.f32 0.2, %v532_v41 }
 0x309   :  { %v552_v45 = vmul.f32 0.0, %v544_v43 }
 0x30a   :  { %v545_v47 = vsel %vm537_vm5, %v532_v41, %v541_v44  ;;  %v625_v41 = vrot.slane %v549_v36, %v2331_v27 }
 0x30b   :  { %v554_v48 = vadd.f32 %v552_v45, %v542_v46  ;;  %v553_v49 = vmul.f32 0.0, %v545_v47  ;;  %v629_v45 = vrot.slane %v549_v36, %v2334_v29 }
 0x30d   :  { %v555_v51 = vrot.slane %v554_v48, 4  ;;  %v561_v52 = vadd.f32 %v553_v49, %v543_v50 }
 0x30f   :  { %v556_v53 = vadd.f32 %v555_v51, %v554_v48  ;;  %v562_v54 = vrot.slane %v561_v52, 4 }
 0x311   :  { %v557_v55 = vrot.slane %v556_v53, 2  ;;  %v563_v56 = vadd.f32 %v562_v54, %v561_v52 }
 0x313   :  { %v558_v57 = vadd.f32 %v557_v55, %v556_v53  ;;  %v564_v58 = vrot.slane %v563_v56, 2  ;;  %v2067_v55 = vld [vmem:[#allocation9 + $0x78] sm:$0xff]  }
 0x314   :  { %1829 = vmatprep.subr.bf16.mxu1 %v2067_v55 }
 0x315   :  { %v559_v59 = vrot.slane %v558_v57, 1  ;;  %v565_v60 = vadd.f32 %v564_v58, %v563_v56  ;;  %v2068_v56 = vld [vmem:[#allocation9 + $0xf8] sm:$0xff]  }
 0x316   :  { %v2070_v58 = vld [vmem:[#allocation9 + $0xb8] sm:$0xff]   ;;  %1851 = vmatprep.subr.bf16.mxu0 %v2068_v56 }
 0x317   :  { %v560_v61 = vadd.f32 %v559_v59, %v558_v57  ;;  %v566_v62 = vrot.slane %v565_v60, 1  ;;  %v2069_v57 = vld [vmem:[#allocation9 + $0x38] sm:$0xff]   ;;  %v2071_v59 = vld [vmem:[#allocation9 + $0x70] sm:$0xff]  }
 0x319   :  { %v568_v63 = vmul.f32 0.125, %v560_v61  ;;  %v567_v0 = vadd.f32 %v566_v62, %v565_v60  ;;  %v2072_v60 = vld [vmem:[#allocation9 + $0xf0] sm:$0xff]  }
 0x31a   :  { %v2073_v61 = vld [vmem:[#allocation9 + $0x30] sm:$0xff]  }
 0x31b   :  { %v570_v1 = vsub.f32 %v542_v46, %v568_v63  ;;  %v572_v2 = vsub.f32 %v544_v43, %v568_v63  ;;  %v569_v3 = vmul.f32 0.125, %v567_v0  ;;  %v2074_v62 = vld [vmem:[#allocation9 + $0xb0] sm:$0xff]   ;;  %v2075_v63 = vld [vmem:[#allocation9 + $0x68] sm:$0xff]  }
 0x31c   :  { %v2076_v0 = vld [vmem:[#allocation9 + $0xe8] sm:$0xff]  }
 0x31d   :  { %v576_v4 = vmul.f32 %v572_v2, %v572_v2  ;;  %v571_v5 = vsub.f32 %v543_v50, %v569_v3  ;;  %v573_v6 = vsub.f32 %v545_v47, %v569_v3  ;;  %v574_v7 = vmul.f32 %v570_v1, %v570_v1  ;;  %v2079_v3 = vld [vmem:[#allocation9 + $0x60] sm:$0xff]  }
 0x31e   :  { %v609_v37 = vmul.f32 %v602_v34, %v570_v1  ;;  %v611_v38 = vmul.f32 %v602_v34, %v572_v2  ;;  %v2077_v1 = vld [vmem:[#allocation9 + $0x28] sm:$0xff]  }
 0x31f   :  { %v580_v8 = vmul.f32 0.0, %v576_v4  ;;  %v577_v9 = vmul.f32 %v573_v6, %v573_v6  ;;  %v575_v11 = vmul.f32 %v571_v5, %v571_v5  ;;  %v612_v43 = vmul.f32 %v606_v35, %v573_v6  ;;  %v2078_v2 = vld [vmem:[#allocation9 + $0xa8] sm:$0xff]   ;;  %v2080_v4 = vld [vmem:[#allocation9 + $0xe0] sm:$0xff]  }
 0x320   :  { %v610_v44 = vmul.f32 %v606_v35, %v571_v5  ;;  %v2081_v5 = vld [vmem:[#allocation9 + $0x20] sm:$0xff]  }
 0x321   :  { %v582_v10 = vadd.f32 %v580_v8, %v574_v7  ;;  %v581_v12 = vmul.f32 0.0, %v577_v9  ;;  %v2082_v6 = vld [vmem:[#allocation9 + $0xa0] sm:$0xff]   ;;  %v2083_v7 = vld [vmem:[#allocation9 + $0x58] sm:$0xff]  }
 0x322   :  { %v2084_v8 = vld [vmem:[#allocation9 + $0xd8] sm:$0xff]  }
 0x323   :  { %v583_v13 = vrot.slane %v582_v10, 4  ;;  %v589_v14 = vadd.f32 %v581_v12, %v575_v11  ;;  %v2085_v9 = vld [vmem:[#allocation9 + $0x18] sm:$0xff]   ;;  %v2087_v11 = vld [vmem:[#allocation9 + $0x50] sm:$0xff]  }
 0x324   :  { %v2088_v12 = vld [vmem:[#allocation9 + $0xd0] sm:$0xff]  }
 0x325   :  { %v584_v15 = vadd.f32 %v583_v13, %v582_v10  ;;  %v590_v16 = vrot.slane %v589_v14, 4  ;;  %v2086_v10 = vld [vmem:[#allocation9 + $0x98] sm:$0xff]   ;;  %v2089_v13 = vld [vmem:[#allocation9 + $0x10] sm:$0xff]  }
 0x327   :  { %v585_v17 = vrot.slane %v584_v15, 2  ;;  %v591_v18 = vadd.f32 %v590_v16, %v589_v14  ;;  %v2090_v14 = vld [vmem:[#allocation9 + $0x90] sm:$0xff]   ;;  %v2092_v16 = vld [vmem:[#allocation9 + $0xc8] sm:$0xff]  }
 0x329   :  { %v586_v19 = vadd.f32 %v585_v17, %v584_v15  ;;  %v592_v20 = vrot.slane %v591_v18, 2  ;;  %v2091_v15 = vld [vmem:[#allocation9 + $0x48] sm:$0xff]  }
 0x32a   :  { %v2093_v17 = vld [vmem:[#allocation9 + $0x8] sm:$0xff]  }
 0x32b   :  { %v587_v21 = vrot.slane %v586_v19, 1  ;;  %v593_v22 = vadd.f32 %v592_v20, %v591_v18  ;;  %v2094_v18 = vld [vmem:[#allocation9 + $0x88] sm:$0xff]   ;;  %v2096_v20 = vld [vmem:[#allocation9 + $0xc0] sm:$0xff]  }
 0x32d   :  { %v588_v23 = vadd.f32 %v587_v21, %v586_v19  ;;  %v594_v24 = vrot.slane %v593_v22, 1  ;;  %v2095_v19 = vld [vmem:[#allocation9 + $0x40] sm:$0xff]  }
 0x32e   :  { %v2097_v21 = vld [vmem:[#allocation9] sm:$0xff]  }
 0x32f   :  { %v596_v25 = vmul.f32 0.125, %v588_v23  ;;  %v595_v28 = vadd.f32 %v594_v24, %v593_v22  ;;  %v2098_v22 = vld [vmem:[#allocation9 + $0x80] sm:$0xff]   ;;  %v2343_v23 = vsub.s32 2, %v2328_v26 }
 0x330   :  { %v703_v24 = vld [vmem:[#allocation10 + $0x7] ss:$8 sm:$0xf] }
 0x331   :  { %v613_v30 = vadd.f32 1e-05, %v596_v25  ;;  %v597_v31 = vmul.f32 0.125, %v595_v28  ;;  %v708_v25 = vrot.slane %v703_v24, %v2331_v27  ;;  %v716_v28 = vrot.slane %v703_v24, %v2343_v23 }
 0x332   :  { %v712_v35 = vrot.slane %v703_v24, %v2334_v29 }
 0x333   :  { %2101 = vrsqrt.f32 %v613_v30  ;;  %v614_v32 = vadd.f32 1e-05, %v597_v31  ;;  %v2348_v30 = vsub.s32 3, %v2328_v26 }
 0x335   :  { %2103 = vrsqrt.f32 %v614_v32 }
 0x340   :  { %v2102_v39 = vpop.eup %2101 }
 0x341   :  { %v619_v40 = vmul.f32 %v2102_v39, %v611_v38  ;;  %v617_v42 = vmul.f32 %v2102_v39, %v609_v37  ;;  %v720_v37 = vrot.slane %v703_v24, %v2348_v30 }
 0x342   :  { %v2104_v46 = vpop.eup %2103 }
 0x343   :  { %v618_v47 = vmul.f32 %v2104_v46, %v610_v44  ;;  %v620_v48 = vmul.f32 %v2104_v46, %v612_v43  ;;  %v632_v49 = vadd.f32 %v625_v41, %v617_v42  ;;  %v634_v50 = vadd.f32 %v625_v41, %v619_v40 }
 0x345   :  { %v633_v51 = vadd.f32 %v629_v45, %v618_v47  ;;  %v635_v52 = vadd.f32 %v629_v45, %v620_v48  ;;  %v636_v54 = vpack.c.bf16 %v634_v50, %v632_v49 }
 0x347   :  { %v637_v53 = vpack.c.bf16 %v635_v52, %v633_v51 }
 0x349   :  { %1077 = vmatprep.mubr.bf16.mxu1 %v637_v53  ;;  %1120 = vmatprep.mubr.bf16.mxu0 %v637_v53 }
 0x34a   :  { %1078 = vmatmul.mubr.bf16.vlgmr.msra.gmra.mxu1 %v636_v54  ;;  %1121 = vmatmul.mubr.bf16.vlgmr.msra.gmra.mxu0 %v636_v54 }
 0x34b   :  { %1830 = vmatpush3.bf16.msra.mxu1 %v2069_v57  ;;  %1852 = vmatpush3.bf16.msra.mxu0 %v2070_v58 }
 0x34c   :  { %1831 = vmatprep.subr.bf16.mxu1 %v2071_v59  ;;  %1853 = vmatprep.subr.bf16.mxu0 %v2072_v60 }
 0x34f   :  { %1832 = vmatpush3.bf16.msra.mxu1 %v2073_v61  ;;  %1854 = vmatpush3.bf16.msra.mxu0 %v2074_v62 }
 0x350   :  { %1833 = vmatprep.subr.bf16.mxu1 %v2075_v63  ;;  %1855 = vmatprep.subr.bf16.mxu0 %v2076_v0 }
 0x353   :  { %1834 = vmatpush3.bf16.msra.mxu1 %v2077_v1  ;;  %1856 = vmatpush3.bf16.msra.mxu0 %v2078_v2 }
 0x354   :  { %1835 = vmatprep.subr.bf16.mxu1 %v2079_v3  ;;  %1857 = vmatprep.subr.bf16.mxu0 %v2080_v4 }
 0x357   :  { %1836 = vmatpush3.bf16.msra.mxu1 %v2081_v5  ;;  %1858 = vmatpush3.bf16.msra.mxu0 %v2082_v6 }
 0x358   :  { %1837 = vmatprep.subr.bf16.mxu1 %v2083_v7  ;;  %1859 = vmatprep.subr.bf16.mxu0 %v2084_v8 }
 0x35b   :  { %1838 = vmatpush3.bf16.msra.mxu1 %v2085_v9  ;;  %1860 = vmatpush3.bf16.msra.mxu0 %v2086_v10 }
 0x35c   :  { %1839 = vmatprep.subr.bf16.mxu1 %v2087_v11  ;;  %1861 = vmatprep.subr.bf16.mxu0 %v2088_v12 }
 0x35f   :  { %1840 = vmatpush3.bf16.msra.mxu1 %v2089_v13  ;;  %1862 = vmatpush3.bf16.msra.mxu0 %v2090_v14 }
 0x360   :  { %1841 = vmatprep.subr.bf16.mxu1 %v2091_v15  ;;  %1863 = vmatprep.subr.bf16.mxu0 %v2092_v16 }
 0x363   :  { %1842 = vmatpush3.bf16.msra.mxu1 %v2093_v17  ;;  %1864 = vmatpush3.bf16.msra.mxu0 %v2094_v18 }
 0x364   :  { %1843 = vmatprep.subr.bf16.mxu1 %v2095_v19  ;;  %1865 = vmatprep.subr.bf16.mxu0 %v2096_v20 }
 0x367   :  { %1844 = vmatpush3.bf16.msra.mxu1 %v2097_v21  ;;  %1866 = vmatpush3.bf16.msra.mxu0 %v2098_v22 }
 0x40a   :  { %v1079_v31 = vpop.f32.mrf.mxu1  ;;  %v1122_v32 = vpop.f32.mrf.mxu0 }
 0x40b   :  { %v1080_v33 = vadd.f32 %v1079_v31, %v708_v25  ;;  %v1123_v34 = vadd.f32 %v1122_v32, %v716_v28 }
 0x40c   :  { %v1081_v36 = vpop.f32.mrf.mxu1  ;;  %v1124_v38 = vpop.f32.mrf.mxu0 }
 0x40d   :  { %vm1131_vm7 = vcmp.gt.f32.partialorder %v1080_v33, 0.0  ;;  %v1139_v39 = vmul.f32 0.2, %v1080_v33  ;;  %v1141_v42 = vmul.f32 0.2, %v1123_v34  ;;  %v1082_v43 = vadd.f32 %v1081_v36, %v712_v35 }
 0x40e   :  { %v1083_v40 = vpop.f32.mrf.mxu1  ;;  %v1126_v41 = vpop.f32.mrf.mxu0  ;;  %vm1133_vm8 = vcmp.gt.f32.partialorder %v1123_v34, 0.0  ;;  %v1125_v26 = vadd.f32 %v1124_v38, %v720_v37 }
 0x40f   :  { %v1084_v44 = vadd.f32 %v1083_v40, %v708_v25  ;;  %v1127_v45 = vadd.f32 %v1126_v41, %v716_v28  ;;  %v1147_v50 = vsel %vm1131_vm7, %v1080_v33, %v1139_v39  ;;  %v1149_v53 = vsel %vm1133_vm8, %v1123_v34, %v1141_v42 }
 0x410   :  { %v1085_v46 = vpop.f32.mrf.mxu1  ;;  %v1128_v47 = vpop.f32.mrf.mxu0  ;;  %v1140_v54 = vmul.f32 0.2, %v1082_v43  ;;  %vm1132_vm12 = vcmp.gt.f32.partialorder %v1082_v43, 0.0  ;;  %v1142_v60 = vmul.f32 0.2, %v1125_v26  ;;  %vm1134_vm14 = vcmp.gt.f32.partialorder %v1125_v26, 0.0 }
 0x411   :  { %vm1135_vm9 = vcmp.gt.f32.partialorder %v1084_v44, 0.0  ;;  %v1143_v48 = vmul.f32 0.2, %v1084_v44  ;;  %vm1137_vm10 = vcmp.gt.f32.partialorder %v1127_v45, 0.0  ;;  %v1145_v49 = vmul.f32 0.2, %v1127_v45 }
 0x412   :  { %v1086_v51 = vadd.f32 %v1085_v46, %v712_v35  ;;  %v1129_v52 = vadd.f32 %v1128_v47, %v720_v37  ;;  %v1148_v3 = vsel %vm1132_vm12, %v1082_v43, %v1140_v54  ;;  %v1150_v7 = vsel %vm1134_vm14, %v1125_v26, %v1142_v60 }
 0x413   :  { %v1151_v55 = vsel %vm1135_vm9, %v1084_v44, %v1143_v48  ;;  %v1153_v56 = vsel %vm1137_vm10, %v1127_v45, %v1145_v49 }
 0x414   :  { %v1163_v57 = vmul.f32 0.0, %v1151_v55  ;;  %v1165_v58 = vmul.f32 0.0, %v1153_v56  ;;  %vm1136_vm11 = vcmp.gt.f32.partialorder %v1086_v51, 0.0  ;;  %v1144_v59 = vmul.f32 0.2, %v1086_v51 }
 0x415   :  { %vm1138_vm13 = vcmp.gt.f32.partialorder %v1129_v52, 0.0  ;;  %v1146_v61 = vmul.f32 0.2, %v1129_v52 }
 0x416   :  { %v1167_v62 = vadd.f32 %v1163_v57, %v1147_v50  ;;  %v1181_v63 = vadd.f32 %v1165_v58, %v1149_v53  ;;  %v1152_v0 = vsel %vm1136_vm11, %v1086_v51, %v1144_v59 }
 0x417   :  { %v1164_v1 = vmul.f32 0.0, %v1152_v0  ;;  %v1154_v2 = vsel %vm1138_vm13, %v1129_v52, %v1146_v61 }
 0x418   :  { %v1168_v4 = vrot.slane %v1167_v62, 4  ;;  %v1182_v5 = vrot.slane %v1181_v63, 4  ;;  %v1166_v6 = vmul.f32 0.0, %v1154_v2 }
 0x419   :  { %v1174_v8 = vadd.f32 %v1164_v1, %v1148_v3 }
 0x41a   :  { %v1169_v9 = vadd.f32 %v1168_v4, %v1167_v62  ;;  %v1183_v10 = vadd.f32 %v1182_v5, %v1181_v63  ;;  %v1188_v11 = vadd.f32 %v1166_v6, %v1150_v7 }
 0x41b   :  { %v1175_v12 = vrot.slane %v1174_v8, 4 }
 0x41c   :  { %v1170_v13 = vrot.slane %v1169_v9, 2  ;;  %v1184_v14 = vrot.slane %v1183_v10, 2  ;;  %v1189_v15 = vrot.slane %v1188_v11, 4 }
 0x41d   :  { %v1176_v16 = vadd.f32 %v1175_v12, %v1174_v8 }
 0x41e   :  { %v1171_v17 = vadd.f32 %v1170_v13, %v1169_v9  ;;  %v1185_v18 = vadd.f32 %v1184_v14, %v1183_v10  ;;  %v1190_v19 = vadd.f32 %v1189_v15, %v1188_v11 }
 0x41f   :  { %v1177_v20 = vrot.slane %v1176_v16, 2 }
 0x420   :  { %v1172_v21 = vrot.slane %v1171_v17, 1  ;;  %v1186_v22 = vrot.slane %v1185_v18, 1  ;;  %v1191_v24 = vrot.slane %v1190_v19, 2 }
 0x421   :  { %v1178_v25 = vadd.f32 %v1177_v20, %v1176_v16 }
 0x422   :  { %v1173_v28 = vadd.f32 %v1172_v21, %v1171_v17  ;;  %v1187_v31 = vadd.f32 %v1186_v22, %v1185_v18  ;;  %v1192_v32 = vadd.f32 %v1191_v24, %v1190_v19 }
 0x423   :  { %v1179_v33 = vrot.slane %v1178_v25, 1 }
 0x424   :  { %v1195_v34 = vmul.f32 0.125, %v1173_v28  ;;  %v1197_v35 = vmul.f32 0.125, %v1187_v31  ;;  %v1193_v36 = vrot.slane %v1192_v32, 1 }
 0x425   :  { %v1180_v37 = vadd.f32 %v1179_v33, %v1178_v25 }
 0x426   :  { %v2353_v38 = vsub.f32 %v1147_v50, %v1195_v34  ;;  %v2355_v39 = vsub.f32 %v1151_v55, %v1195_v34  ;;  %v2357_v40 = vsub.f32 %v1153_v56, %v1197_v35  ;;  %v2359_v41 = vsub.f32 %v1149_v53, %v1197_v35 }
 0x427   :  { %v1196_v42 = vmul.f32 0.125, %v1180_v37  ;;  %v1194_v43 = vadd.f32 %v1193_v36, %v1192_v32  ;;  %v1156_v37 = vld [vmem:[#allocation10 + $0x20] ss:$8 sm:$0xf] }
 0x428   :  { %v1211_v44 = vmul.f32 %v2355_v39, %v2355_v39  ;;  %v1207_v45 = vmul.f32 %v2353_v38, %v2353_v38  ;;  %v1213_v26 = vmul.f32 %v2357_v40, %v2357_v40  ;;  %v1209_v50 = vmul.f32 %v2359_v41, %v2359_v41 }
 0x429   :  { %v2367_v47 = vsub.f32 %v1148_v3, %v1196_v42  ;;  %v2369_v48 = vsub.f32 %v1152_v0, %v1196_v42  ;;  %v1198_v49 = vmul.f32 0.125, %v1194_v43  ;;  %v1259_v42 = vrot.slane %v1156_v37, %v2331_v27 }
 0x42a   :  { %v1219_v46 = vmul.f32 0.0, %v1211_v44  ;;  %v1221_v51 = vmul.f32 0.0, %v1213_v26  ;;  %v1267_v43 = vrot.slane %v1156_v37, %v2343_v23  ;;  %v1263_v44 = vrot.slane %v1156_v37, %v2334_v29 }
 0x42b   :  { %v1212_v53 = vmul.f32 %v2369_v48, %v2369_v48  ;;  %v2375_v55 = vsub.f32 %v1150_v7, %v1198_v49  ;;  %v2377_v56 = vsub.f32 %v1154_v2, %v1198_v49  ;;  %v1208_v58 = vmul.f32 %v2367_v47, %v2367_v47 }
 0x42c   :  { %v1223_v52 = vadd.f32 %v1219_v46, %v1207_v45  ;;  %v1237_v54 = vadd.f32 %v1221_v51, %v1209_v50  ;;  %v1158_v45 = vld [vmem:[#allocation10 + $0x21] ss:$8 sm:$0xf]  ;;  %v1276_v46 = vmul.f32 %v1259_v42, %v2353_v38  ;;  %v1280_v49 = vmul.f32 %v1259_v42, %v2355_v39 }
 0x42d   :  { %v1220_v59 = vmul.f32 0.0, %v1212_v53  ;;  %v1214_v61 = vmul.f32 %v2377_v56, %v2377_v56  ;;  %v1210_v1 = vmul.f32 %v2375_v55, %v2375_v55  ;;  %v1271_v50 = vrot.slane %v1156_v37, %v2348_v30 }
 0x42e   :  { %v1224_v57 = vrot.slane %v1223_v52, 4  ;;  %v1238_v60 = vrot.slane %v1237_v54, 4  ;;  %v1308_v53 = vrot.slane %v1158_v45, %v2334_v29  ;;  %v1316_v39 = vrot.slane %v1158_v45, %v2348_v30 }
 0x42f   :  { %v1230_v63 = vadd.f32 %v1220_v59, %v1208_v58  ;;  %v1222_v3 = vmul.f32 0.0, %v1214_v61  ;;  %v1278_v58 = vmul.f32 %v1267_v43, %v2359_v41  ;;  %v1282_v59 = vmul.f32 %v1267_v43, %v2357_v40 }
 0x430   :  { %v1225_v62 = vadd.f32 %v1224_v57, %v1223_v52  ;;  %v1239_v0 = vadd.f32 %v1238_v60, %v1237_v54  ;;  %v1304_v57 = vrot.slane %v1158_v45, %v2331_v27  ;;  %v1281_v60 = vmul.f32 %v1263_v44, %v2369_v48 }
 0x431   :  { %v1231_v5 = vrot.slane %v1230_v63, 4  ;;  %v1244_v6 = vadd.f32 %v1222_v3, %v1210_v1  ;;  %v1277_v61 = vmul.f32 %v1263_v44, %v2367_v47  ;;  %v1283_v3 = vmul.f32 %v1271_v50, %v2377_v56  ;;  %v1397_v56 = vld [vmem:[#allocation10 + $0x22] ss:$0 sm:$0xff] }
 0x432   :  { %v1226_v4 = vrot.slane %v1225_v62, 2  ;;  %v1240_v2 = vrot.slane %v1239_v0, 2  ;;  %v1279_v27 = vmul.f32 %v1271_v50, %v2375_v55 }
 0x433   :  { %v1232_v8 = vadd.f32 %v1231_v5, %v1230_v63  ;;  %v1245_v10 = vrot.slane %v1244_v6, 4 }
 0x434   :  { %v1227_v7 = vadd.f32 %v1226_v4, %v1225_v62  ;;  %v1241_v9 = vadd.f32 %v1240_v2, %v1239_v0  ;;  %v1312_v62 = vrot.slane %v1158_v45, %v2343_v23 }
 0x435   :  { %v1233_v12 = vrot.slane %v1232_v8, 2  ;;  %v1246_v14 = vadd.f32 %v1245_v10, %v1244_v6 }
 0x436   :  { %v1228_v11 = vrot.slane %v1227_v7, 1  ;;  %v1242_v13 = vrot.slane %v1241_v9, 1 }
 0x437   :  { %v1234_v16 = vadd.f32 %v1233_v12, %v1232_v8  ;;  %v1247_v18 = vrot.slane %v1246_v14, 2 }
 0x438   :  { %v1229_v15 = vadd.f32 %v1228_v11, %v1227_v7  ;;  %v1243_v17 = vadd.f32 %v1242_v13, %v1241_v9 }
 0x439   :  { %v1235_v20 = vrot.slane %v1234_v16, 1  ;;  %v1248_v22 = vadd.f32 %v1247_v18, %v1246_v14 }
 0x43a   :  { %v1251_v19 = vmul.f32 0.125, %v1229_v15  ;;  %v1253_v21 = vmul.f32 0.125, %v1243_v17 }
 0x43b   :  { %v1236_v25 = vadd.f32 %v1235_v20, %v1234_v16  ;;  %v1249_v31 = vrot.slane %v1248_v22, 1 }
 0x43c   :  { %v1284_v24 = vadd.f32 1e-05, %v1251_v19  ;;  %v1286_v28 = vadd.f32 1e-05, %v1253_v21 }
 0x43d   :  { %v1252_v32 = vmul.f32 0.125, %v1236_v25  ;;  %v1250_v33 = vadd.f32 %v1249_v31, %v1248_v22 }
 0x43e   :  { %2105 = vrsqrt.f32 %v1284_v24 }
 0x43f   :  { %2107 = vrsqrt.f32 %v1286_v28  ;;  %v1285_v34 = vadd.f32 1e-05, %v1252_v32  ;;  %v1254_v35 = vmul.f32 0.125, %v1250_v33 }
 0x441   :  { %2109 = vrsqrt.f32 %v1285_v34  ;;  %v1287_v36 = vadd.f32 1e-05, %v1254_v35 }
 0x443   :  { %2111 = vrsqrt.f32 %v1287_v36 }
 0x44b   :  { %v2106_v26 = vpop.eup %2105 }
 0x44c   :  { %v2108_v51 = vpop.eup %2107  ;;  %v1296_v52 = vmul.f32 %v2106_v26, %v1280_v49  ;;  %v1292_v54 = vmul.f32 %v2106_v26, %v1276_v46 }
 0x44d   :  { %v1298_v63 = vmul.f32 %v2108_v51, %v1282_v59  ;;  %v1294_v29 = vmul.f32 %v2108_v51, %v1278_v58 }
 0x44e   :  { %v2110_v38 = vpop.eup %2109  ;;  %v1321_v41 = vadd.f32 %v1304_v57, %v1292_v54  ;;  %v1325_v4 = vadd.f32 %v1304_v57, %v1296_v52 }
 0x44f   :  { %v1293_v0 = vmul.f32 %v2110_v38, %v1277_v61  ;;  %v1297_v1 = vmul.f32 %v2110_v38, %v1281_v60  ;;  %v1323_v7 = vadd.f32 %v1312_v62, %v1294_v29  ;;  %v1327_v30 = vadd.f32 %v1312_v62, %v1298_v63 }
 0x450   :  { %v2112_v40 = vpop.eup %2111  ;;  %v1329_v9 = vpack.c.bf16 %v1325_v4, %v1321_v41 }
 0x451   :  { %v1322_v5 = vadd.f32 %v1308_v53, %v1293_v0  ;;  %v1326_v48 = vadd.f32 %v1308_v53, %v1297_v1  ;;  %v1295_v2 = vmul.f32 %v2112_v40, %v1279_v27  ;;  %v1299_v47 = vmul.f32 %v2112_v40, %v1283_v3 }
 0x452   :  { %v1331_v11 = vpack.c.bf16 %v1327_v30, %v1323_v7 }
 0x453   :  { %v1330_v6 = vpack.c.bf16 %v1326_v48, %v1322_v5  ;;  %v1324_v8 = vadd.f32 %v1316_v39, %v1295_v2  ;;  %v1328_v23 = vadd.f32 %v1316_v39, %v1299_v47 }
 0x455   :  { %1622 = vmatprep.mubr.bf16.mxu1 %v1330_v6  ;;  %v1332_v10 = vpack.c.bf16 %v1328_v23, %v1324_v8 }
 0x456   :  { %1623 = vmatmul.mubr.bf16.vlgmr.msra.gmra.mxu1 %v1329_v9 }
 0x457   :  { %1663 = vmatprep.mubr.bf16.mxu0 %v1332_v10 }
 0x458   :  { %1664 = vmatmul.mubr.bf16.vlgmr.msra.gmra.mxu0 %v1331_v11 }
 0x516   :  { %v1845_v55 = vpop.f32.mrf.mxu1 }
 0x518   :  { %v1846_v12 = vpop.f32.mrf.mxu1  ;;  %v1867_v13 = vpop.f32.mrf.mxu0 }
 0x519   :  { %v1847_v14 = vadd.f32 %v1846_v12, %v1845_v55 }
 0x51a   :  { %v1848_v15 = vpop.f32.mrf.mxu1  ;;  %v1868_v17 = vpop.f32.mrf.mxu0 }
 0x51b   :  { %v1625_v16 = vadd.f32 %v1847_v14, %v1397_v56  ;;  %v1869_v18 = vadd.f32 %v1868_v17, %v1867_v13 }
 0x51c   :  { %v1849_v19 = vpop.f32.mrf.mxu1  ;;  %v1870_v20 = vpop.f32.mrf.mxu0 }
 0x51d   :  { %v1850_v21 = vadd.f32 %v1849_v19, %v1848_v15  ;;  %v1666_v22 = vadd.f32 %v1869_v18, %v1625_v16 }
 0x51e   :  { %v1871_v25 = vpop.f32.mrf.mxu0 }
 0x51f   :  { %v1628_v24 = vadd.f32 %v1850_v21, %v1397_v56  ;;  %1672 = vst [vmem:[%s2414_s7] sm:$0xff] %v1666_v22  ;;  %v1872_v28 = vadd.f32 %v1871_v25, %v1870_v20 }
 0x521   :  { %v1669_v31 = vadd.f32 %v1872_v28, %v1628_v24 }
 0x523   :  { %1673 = vst [vmem:[%s2414_s7 + $0x8] sm:$0xff] %v1669_v31 }
 0x524   :  { %1678 = vsyncpa [#allocation3], 1 }
 0x525   :  { %1679 = vsyncpa [#allocation5], 1 }
 0x526   :  { %1680 = vsyncpa [#allocation8], 1 }
 0x527   :  { %1681 = vsyncpa [#allocation11], 1 }

</bundles_post_ra>
